<compile_context>
chip_gen: v6e
topology: v6e:2x2x1
jax: 0.10.0
libtpu: 0.0.40
codegen_flags: <defaults>
</compile_context>

<pallas_src>
import math

import jax
import jax.numpy as jnp
from jax.experimental import pallas as pl
from jax.experimental.pallas import tpu as pltpu

INPUT_SIZE = 784
NUM_CLASSES = 10
HIDDEN = (500, 250, 50)

LANE = 128
MAX_BATCH_TILE = 1024


def _round_up(x, m):
    return ((x + m - 1) // m) * m


# lane-dense (multiple-of-128) padded layer widths
_OUT_PAD = tuple(_round_up(d, LANE) for d in HIDDEN + (NUM_CLASSES,))  # (512, 256, 128, 128)
_IN_PAD = (_round_up(INPUT_SIZE, LANE),) + _OUT_PAD[:-1]               # (896, 512, 256, 128)
_INPUT_PAD = _IN_PAD[0]


def _mlp_kernel(x_ref,
                w1_ref, b1_ref,
                w2_ref, b2_ref,
                w3_ref, b3_ref,
                w4_ref, b4_ref,
                o_ref):
    # Fused 4x (Linear + ReLU).  All matmuls are bf16 x bf16 on the MXU with f32
    # accumulation; bias-add / ReLU in f32.  ReLU on the last layer matches the
    # PyTorch module (fc4_output = F.relu(self.fc4(...))).
    h = x_ref[...]  # bf16 (tb, 896)
    h = jnp.maximum(
        jnp.dot(h, w1_ref[...], preferred_element_type=jnp.float32) + b1_ref[...], 0.0)
    h = jnp.maximum(
        jnp.dot(h.astype(jnp.bfloat16), w2_ref[...],
                preferred_element_type=jnp.float32) + b2_ref[...], 0.0)
    h = jnp.maximum(
        jnp.dot(h.astype(jnp.bfloat16), w3_ref[...],
                preferred_element_type=jnp.float32) + b3_ref[...], 0.0)
    h = jnp.maximum(
        jnp.dot(h.astype(jnp.bfloat16), w4_ref[...],
                preferred_element_type=jnp.float32) + b4_ref[...], 0.0)
    o_ref[...] = h.astype(o_ref.dtype)


def init_params(key):
    """Deterministic init matching nn.Linear defaults (uniform +/- 1/sqrt(fan_in)).

    Weights stored as [in, out] (transposed vs PyTorch's [out, in]) so the kernel
    computes y = relu(x @ W + b); biases stored as [1, out]. Kept in f32 here.
    """
    dims = (INPUT_SIZE,) + HIDDEN + (NUM_CLASSES,)
    params = []
    for i in range(len(dims) - 1):
        fan_in, fan_out = dims[i], dims[i + 1]
        key, kw, kb = jax.random.split(key, 3)
        bound = 1.0 / math.sqrt(fan_in)
        w = jax.random.uniform(kw, (fan_in, fan_out), jnp.float32, -bound, bound)
        b = jax.random.uniform(kb, (1, fan_out), jnp.float32, -bound, bound)
        params.append((w, b))
    return params


def prepare_params(params):
    """One-time prep: zero-pad every layer to lane-dense widths, cast weights to bf16."""
    prepped = []
    for (w, b), d_in, d_out in zip(params, _IN_PAD, _OUT_PAD):
        w_p = jnp.pad(w, ((0, d_in - w.shape[0]), (0, d_out - w.shape[1]))).astype(jnp.bfloat16)
        b_p = jnp.pad(b, ((0, 0), (0, d_out - b.shape[1]))).astype(jnp.float32)
        prepped.append((w_p, b_p))
    return prepped


def _pick_batch_tile(B):
    """Batch tile: multiple of 8, capped at MAX_BATCH_TILE, and chosen so that
    small/medium batches still give >= 2 grid steps (v7x has 2 TensorCores)."""
    half = _round_up(max(1, -(-B // 2)), 8)   # ceil(B/2), rounded to sublane
    return max(8, min(MAX_BATCH_TILE, half))


def simple_fully_connected_nn(x, prepped_params):
    """Forward pass. x: [B, 784] float32; prepped_params from prepare_params()."""
    (w1, b1), (w2, b2), (w3, b3), (w4, b4) = prepped_params
    B = x.shape[0]

    tb = _pick_batch_tile(B)
    b_pad = _round_up(B, tb)

    # Pad batch and feature dims (784 -> 896) with zeros; transfer x as bf16.
    x = jnp.pad(x, ((0, b_pad - B), (0, _INPUT_PAD - INPUT_SIZE))).astype(jnp.bfloat16)

    n_out_pad = _OUT_PAD[-1]

    x_spec = pl.BlockSpec((tb, _INPUT_PAD), lambda i: (i, 0))
    # Constant index_map => weights/biases fetched once and stay resident in VMEM.
    resident = lambda arr: pl.BlockSpec(arr.shape, lambda i: (0,) * arr.ndim)

    args = (x, w1, b1, w2, b2, w3, b3, w4, b4)
    in_specs = [x_spec] + [resident(a) for a in args[1:]]

    flops = 2 * b_pad * sum(di * do for di, do in zip(_IN_PAD, _OUT_PAD))
    bytes_accessed = (
        x.size * 2                                                   # bf16 input
        + sum(w.size * 2 + b.size * 4 for w, b in prepped_params)     # bf16 W, f32 b
        + b_pad * n_out_pad * 4)                                     # f32 output
    cost = pl.CostEstimate(flops=flops, transcendentals=0, bytes_accessed=bytes_accessed)

    out_pad = pl.pallas_call(
        _mlp_kernel,
        out_shape=jax.ShapeDtypeStruct((b_pad, n_out_pad), jnp.float32),
        grid=(b_pad // tb,),
        in_specs=in_specs,
        out_specs=pl.BlockSpec((tb, n_out_pad), lambda i: (i, 0)),
        compiler_params=pltpu.CompilerParams(
            dimension_semantics=("parallel",),        # shards batch across both TCs on v7x
            vmem_limit_bytes=32 * 1024 * 1024),        # headroom for tb=1024 on v5e
        cost_estimate=cost,
    )(*args)

    # Drop batch padding and the lane padding of the 10 logits (outside the kernel,
    # keeping the kernel's output slab lane-dense).
    return out_pad[:B, :NUM_CLASSES]


def _reference(x, params):
    """Pure-JAX reference using the same bf16 operand rounding as the kernel."""
    h = x
    for w, b in params:
        h = jnp.maximum(
            jnp.dot(h.astype(jnp.bfloat16), w.astype(jnp.bfloat16),
                    preferred_element_type=jnp.float32) + b, 0.0)
    return h


if __name__ == "__main__":
    key = jax.random.PRNGKey(0)
    kp, kx = jax.random.split(key)
    params = init_params(kp)
    prepped = prepare_params(params)  # pad + bf16 cast done once, not per call

    # small test batch (grid of 1 step, tb=8)
    batch = 8
    x = jax.random.normal(kx, (batch, INPUT_SIZE), jnp.float32)

    out = simple_fully_connected_nn(x, prepped)
    out = jax.block_until_ready(out)
    ref = _reference(x, params)
    assert out.shape == (batch, NUM_CLASSES)
    # bf16 operands -> modest tolerance vs the bf16-rounded reference
    assert jnp.allclose(out, ref, atol=5e-2, rtol=5e-2)

    # exercise the multi-step grid + batch/feature padding path
    # (B=300 -> tile 152, padded batch 304, grid of 2 "parallel" steps)
    kx2 = jax.random.fold_in(kx, 1)
    x2 = jax.random.normal(kx2, (300, INPUT_SIZE), jnp.float32)
    out2 = jax.block_until_ready(simple_fully_connected_nn(x2, prepped))
    ref2 = _reference(x2, params)
    assert out2.shape == (300, NUM_CLASSES)
    assert jnp.allclose(out2, ref2, atol=5e-2, rtol=5e-2)

    print("KERNEL_OK")
</pallas_src>

<mosaic_0001>
module attributes {stable_mosaic.version = 11 : i64} {
  func.func @_mlp_kernel(%arg0: i32, %arg1: memref<8x896xbf16, #tpu.memory_space<vmem>>, %arg2: memref<896x512xbf16, #tpu.memory_space<vmem>>, %arg3: memref<1x512xf32, #tpu.memory_space<vmem>>, %arg4: memref<512x256xbf16, #tpu.memory_space<vmem>>, %arg5: memref<1x256xf32, #tpu.memory_space<vmem>>, %arg6: memref<256x128xbf16, #tpu.memory_space<vmem>>, %arg7: memref<1x128xf32, #tpu.memory_space<vmem>>, %arg8: memref<128x128xbf16, #tpu.memory_space<vmem>>, %arg9: memref<1x128xf32, #tpu.memory_space<vmem>>, %arg10: memref<8x128xf32, #tpu.memory_space<vmem>>) attributes {dimension_semantics = [#tpu.dimension_semantics<parallel>], iteration_bounds = array<i64: 1>, scalar_prefetch = 0 : i64, scratch_operands = 0 : i64, tpu.core_type = #tpu.core_type<tc>, window_params = [{transform_indices = @transform_0, window_bounds = array<i64: 8, 896>}, {pipeline_mode = #tpu.pipeline_mode<synchronous>, transform_indices = @transform_1, window_bounds = array<i64: 896, 512>}, {pipeline_mode = #tpu.pipeline_mode<synchronous>, transform_indices = @transform_2, window_bounds = array<i64: 1, 512>}, {pipeline_mode = #tpu.pipeline_mode<synchronous>, transform_indices = @transform_3, window_bounds = array<i64: 512, 256>}, {pipeline_mode = #tpu.pipeline_mode<synchronous>, transform_indices = @transform_4, window_bounds = array<i64: 1, 256>}, {pipeline_mode = #tpu.pipeline_mode<synchronous>, transform_indices = @transform_5, window_bounds = array<i64: 256, 128>}, {pipeline_mode = #tpu.pipeline_mode<synchronous>, transform_indices = @transform_6, window_bounds = array<i64: 1, 128>}, {pipeline_mode = #tpu.pipeline_mode<synchronous>, transform_indices = @transform_7, window_bounds = array<i64: 128, 128>}, {pipeline_mode = #tpu.pipeline_mode<synchronous>, transform_indices = @transform_8, window_bounds = array<i64: 1, 128>}, {transform_indices = @transform_9, window_bounds = array<i64: 8, 128>}]} {
    %c0 = arith.constant 0 : index
    %c0_0 = arith.constant 0 : index
    %0 = vector.load %arg1[%c0, %c0_0] : memref<8x896xbf16, #tpu.memory_space<vmem>>, vector<8x896xbf16>
    %c0_1 = arith.constant 0 : index
    %c0_2 = arith.constant 0 : index
    %1 = vector.load %arg2[%c0_1, %c0_2] : memref<896x512xbf16, #tpu.memory_space<vmem>>, vector<896x512xbf16>
    %cst = arith.constant dense<0.000000e+00> : vector<8x512xf32>
    %2 = tpu.matmul %0, %1, %cst {dimension_numbers = #tpu.dot_dimension_numbers<[1], [0], [0], [1], [0, 0, 1, 1], [], []>} : vector<8x896xbf16>, vector<896x512xbf16>, vector<8x512xf32> -> vector<8x512xf32>
    %c0_3 = arith.constant 0 : index
    %c0_4 = arith.constant 0 : index
    %3 = vector.load %arg3[%c0_3, %c0_4] : memref<1x512xf32, #tpu.memory_space<vmem>>, vector<1x512xf32>
    %4 = vector.broadcast %3 : vector<1x512xf32> to vector<8x512xf32>
    %5 = arith.addf %2, %4 : vector<8x512xf32>
    %cst_5 = arith.constant 0.000000e+00 : f32
    %6 = vector.broadcast %cst_5 : f32 to vector<8x512xf32>
    %7 = arith.maximumf %5, %6 : vector<8x512xf32>
    %8 = arith.truncf %7 : vector<8x512xf32> to vector<8x512xbf16>
    %c0_6 = arith.constant 0 : index
    %c0_7 = arith.constant 0 : index
    %9 = vector.load %arg4[%c0_6, %c0_7] : memref<512x256xbf16, #tpu.memory_space<vmem>>, vector<512x256xbf16>
    %cst_8 = arith.constant dense<0.000000e+00> : vector<8x256xf32>
    %10 = tpu.matmul %8, %9, %cst_8 {dimension_numbers = #tpu.dot_dimension_numbers<[1], [0], [0], [1], [0, 0, 1, 1], [], []>} : vector<8x512xbf16>, vector<512x256xbf16>, vector<8x256xf32> -> vector<8x256xf32>
    %c0_9 = arith.constant 0 : index
    %c0_10 = arith.constant 0 : index
    %11 = vector.load %arg5[%c0_9, %c0_10] : memref<1x256xf32, #tpu.memory_space<vmem>>, vector<1x256xf32>
    %12 = vector.broadcast %11 : vector<1x256xf32> to vector<8x256xf32>
    %13 = arith.addf %10, %12 : vector<8x256xf32>
    %cst_11 = arith.constant 0.000000e+00 : f32
    %14 = vector.broadcast %cst_11 : f32 to vector<8x256xf32>
    %15 = arith.maximumf %13, %14 : vector<8x256xf32>
    %16 = arith.truncf %15 : vector<8x256xf32> to vector<8x256xbf16>
    %c0_12 = arith.constant 0 : index
    %c0_13 = arith.constant 0 : index
    %17 = vector.load %arg6[%c0_12, %c0_13] : memref<256x128xbf16, #tpu.memory_space<vmem>>, vector<256x128xbf16>
    %cst_14 = arith.constant dense<0.000000e+00> : vector<8x128xf32>
    %18 = tpu.matmul %16, %17, %cst_14 {dimension_numbers = #tpu.dot_dimension_numbers<[1], [0], [0], [1], [0, 0, 1, 1], [], []>} : vector<8x256xbf16>, vector<256x128xbf16>, vector<8x128xf32> -> vector<8x128xf32>
    %c0_15 = arith.constant 0 : index
    %c0_16 = arith.constant 0 : index
    %19 = vector.load %arg7[%c0_15, %c0_16] : memref<1x128xf32, #tpu.memory_space<vmem>>, vector<1x128xf32>
    %20 = vector.broadcast %19 : vector<1x128xf32> to vector<8x128xf32>
    %21 = arith.addf %18, %20 : vector<8x128xf32>
    %cst_17 = arith.constant 0.000000e+00 : f32
    %22 = vector.broadcast %cst_17 : f32 to vector<8x128xf32>
    %23 = arith.maximumf %21, %22 : vector<8x128xf32>
    %24 = arith.truncf %23 : vector<8x128xf32> to vector<8x128xbf16>
    %c0_18 = arith.constant 0 : index
    %c0_19 = arith.constant 0 : index
    %25 = vector.load %arg8[%c0_18, %c0_19] : memref<128x128xbf16, #tpu.memory_space<vmem>>, vector<128x128xbf16>
    %cst_20 = arith.constant dense<0.000000e+00> : vector<8x128xf32>
    %26 = tpu.matmul %24, %25, %cst_20 {dimension_numbers = #tpu.dot_dimension_numbers<[1], [0], [0], [1], [0, 0, 1, 1], [], []>} : vector<8x128xbf16>, vector<128x128xbf16>, vector<8x128xf32> -> vector<8x128xf32>
    %c0_21 = arith.constant 0 : index
    %c0_22 = arith.constant 0 : index
    %27 = vector.load %arg9[%c0_21, %c0_22] : memref<1x128xf32, #tpu.memory_space<vmem>>, vector<1x128xf32>
    %28 = vector.broadcast %27 : vector<1x128xf32> to vector<8x128xf32>
    %29 = arith.addf %26, %28 : vector<8x128xf32>
    %cst_23 = arith.constant 0.000000e+00 : f32
    %30 = vector.broadcast %cst_23 : f32 to vector<8x128xf32>
    %31 = arith.maximumf %29, %30 : vector<8x128xf32>
    %c0_24 = arith.constant 0 : index
    %c0_25 = arith.constant 0 : index
    %32 = vector.load %arg10[%c0_24, %c0_25] : memref<8x128xf32, #tpu.memory_space<vmem>>, vector<8x128xf32>
    tpu.vector_store %arg10[%c0_24, %c0_25], %31 {strides = array<i32>} : memref<8x128xf32, #tpu.memory_space<vmem>>, vector<8x128xf32>,
    return
  }
  func.func @transform_0(%arg0: i32) -> (i32, i32) {
    %c0_i32 = arith.constant 0 : i32
    %c0_i32_0 = arith.constant 0 : i32
    return %arg0, %c0_i32 : i32, i32
  }
  func.func @transform_1(%arg0: i32) -> (i32, i32) {
    %c0_i32 = arith.constant 0 : i32
    %c0_i32_0 = arith.constant 0 : i32
    %c0_i32_1 = arith.constant 0 : i32
    return %c0_i32, %c0_i32_0 : i32, i32
  }
  func.func @transform_2(%arg0: i32) -> (i32, i32) {
    %c0_i32 = arith.constant 0 : i32
    %c0_i32_0 = arith.constant 0 : i32
    %c0_i32_1 = arith.constant 0 : i32
    return %c0_i32, %c0_i32_0 : i32, i32
  }
  func.func @transform_3(%arg0: i32) -> (i32, i32) {
    %c0_i32 = arith.constant 0 : i32
    %c0_i32_0 = arith.constant 0 : i32
    %c0_i32_1 = arith.constant 0 : i32
    return %c0_i32, %c0_i32_0 : i32, i32
  }
  func.func @transform_4(%arg0: i32) -> (i32, i32) {
    %c0_i32 = arith.constant 0 : i32
    %c0_i32_0 = arith.constant 0 : i32
    %c0_i32_1 = arith.constant 0 : i32
    return %c0_i32, %c0_i32_0 : i32, i32
  }
  func.func @transform_5(%arg0: i32) -> (i32, i32) {
    %c0_i32 = arith.constant 0 : i32
    %c0_i32_0 = arith.constant 0 : i32
    %c0_i32_1 = arith.constant 0 : i32
    return %c0_i32, %c0_i32_0 : i32, i32
  }
  func.func @transform_6(%arg0: i32) -> (i32, i32) {
    %c0_i32 = arith.constant 0 : i32
    %c0_i32_0 = arith.constant 0 : i32
    %c0_i32_1 = arith.constant 0 : i32
    return %c0_i32, %c0_i32_0 : i32, i32
  }
  func.func @transform_7(%arg0: i32) -> (i32, i32) {
    %c0_i32 = arith.constant 0 : i32
    %c0_i32_0 = arith.constant 0 : i32
    %c0_i32_1 = arith.constant 0 : i32
    return %c0_i32, %c0_i32_0 : i32, i32
  }
  func.func @transform_8(%arg0: i32) -> (i32, i32) {
    %c0_i32 = arith.constant 0 : i32
    %c0_i32_0 = arith.constant 0 : i32
    %c0_i32_1 = arith.constant 0 : i32
    return %c0_i32, %c0_i32_0 : i32, i32
  }
  func.func @transform_9(%arg0: i32) -> (i32, i32) {
    %c0_i32 = arith.constant 0 : i32
    %c0_i32_0 = arith.constant 0 : i32
    return %arg0, %c0_i32 : i32, i32
  }
}

</mosaic_0001>

<bundles_post_ra>
// kernel: tpu_custom_call.1
= control target key start
LH: loop header
LB: loop body
LE: loop exit
PB: predicated region body
PF: predicated region fallthrough
CT: control target
= control target key end

     0   :  { %14 = vsyncpa [#allocation3], 0  ;;  %s3792_s0 = inlined_call_operand.hbm [shape: bf16[8,896], index: 0, kind: input, shape index: {}]   ;;  %s3793_s1 = inlined_call_operand.hbm [shape: bf16[896,512], index: 1, kind: input, shape index: {}]   ;;  %s3794_s2 = inlined_call_operand.hbm [shape: f32[1,512], index: 2, kind: input, shape index: {}]   ;;  %s3795_s3 = inlined_call_operand.hbm [shape: bf16[512,256], index: 3, kind: input, shape index: {}]   ;;  %s3796_s4 = inlined_call_operand.vmem [shape: f32[1,256], index: 4, kind: input, shape index: {}]   ;;  %s3797_s5 = inlined_call_operand.hbm [shape: bf16[256,128], index: 5, kind: input, shape index: {}]   ;;  %s3798_s6 = inlined_call_operand.vmem [shape: f32[1,128], index: 6, kind: input, shape index: {}]   ;;  %s3799_s7 = inlined_call_operand.hbm [shape: bf16[128,128], index: 7, kind: input, shape index: {}]   ;;  %s3800_s8 = inlined_call_operand.vmem [shape: f32[1,128], index: 8, kind: input, shape index: {}]   ;;  %s3801_s9 = inlined_call_operand.hbm [shape: f32[8,128], index: 9, kind: output, shape index: {}]  }
   0x1   :  { %15 = vsyncpa [#allocation6], 0 }
   0x2   :  { %16 = vsyncpa [#allocation9], 0 }
   0x3   :  { %17 = vsyncpa [#allocation12], 0 }
   0x4   :  { %18 = vsyncpa [#allocation4], 0  ;;  %s3634_s30 = smov [#allocation5]  }
   0x5   :  { %s34_s10 = sshll.u32 %s3634_s30, 4  ;;  %s35_s10 = int_to_ptr.vmem [resolvable:$true] %s34_s10 }
   0x6   :  { %s3492_s11 = scalar_lea.vmem %s35_s10, 28672  ;;  %p3497_p1 = scmp.lt.s32.totalorder %s35_s10, %s35_s10 }
   0x7   :  { %p3493_p0 = scmp.ne.s32.totalorder %s35_s10, %s3492_s11  ;;  %p3498_p2 = scmp.lt.s32.totalorder %s3492_s11, %s3492_s11 }
   0x9   :  { %p3499_p3 = por %p3498_p2, %p3497_p1 }
   0xb   :  { %p3500_p4 = pnand %p3499_p3, %p3493_p0 }
   0xd   :  { %3503 = shalt.err (!%p3500_p4)
}
   0xe   :  { %s3635_s12 = smov 256   ;;  %s3636_s13 = smov 16  }
   0xf   :  { %40 = dma.hbm_to_vmem [thread:$0]  %s3793_s1, 28672, %s35_s10, [#allocation6], %s3635_s12, %s3635_s12, %s3636_s13  }
  0x10   :  { %s3637_s16 = smov [#allocation8]  }
  0x11   :  { %s56_s17 = sshll.u32 %s3637_s16, 4  ;;  %s57_s17 = int_to_ptr.vmem [resolvable:$true] %s56_s17 }
  0x12   :  { %s3512_s18 = scalar_lea.vmem %s57_s17, 8192  ;;  %p3517_p6 = scmp.lt.s32.totalorder %s57_s17, %s57_s17 }
  0x13   :  { %p3513_p5 = scmp.ne.s32.totalorder %s57_s17, %s3512_s18  ;;  %p3518_p7 = scmp.lt.s32.totalorder %s3512_s18, %s3512_s18 }
  0x15   :  { %p3519_p8 = por %p3518_p7, %p3517_p6 }
  0x17   :  { %p3520_p9 = pnand %p3519_p8, %p3513_p5 }
  0x19   :  { %3523 = shalt.err (!%p3520_p9)
}
  0x1a   :  { %s3638_s19 = smov 128   ;;  %s3639_s20 = smov 8  }
  0x1b   :  { %62 = dma.hbm_to_vmem [thread:$0]  %s3795_s3, 8192, %s57_s17, [#allocation9], %s3638_s19, %s3638_s19, %s3639_s20  }
  0x1c   :  { %s3640_s23 = smov [#allocation2]   ;;  %s3641_s25 = smov [#allocation7]  }
  0x1d   :  { %s25_s24 = sshll.u32 %s3640_s23, 4  ;;  %s47_s1 = sshll.u32 %s3641_s25, 4  ;;  %s26_s24 = int_to_ptr.vmem [resolvable:$true] %s25_s24  ;;  %s48_s1 = int_to_ptr.vmem [resolvable:$true] %s47_s1 }
  0x1e   :  { %s3532_s26 = scalar_lea.vmem %s26_s24, 448  ;;  %p3537_p11 = scmp.lt.s32.totalorder %s26_s24, %s26_s24 }
  0x1f   :  { %p3533_p10 = scmp.ne.s32.totalorder %s26_s24, %s3532_s26  ;;  %p3538_p12 = scmp.lt.s32.totalorder %s3532_s26, %s3532_s26 }
  0x21   :  { %p3539_p13 = por %p3538_p12, %p3537_p11 }
  0x23   :  { %p3540_p0 = pnand %p3539_p13, %p3533_p10 }
  0x25   :  { %3543 = shalt.err (!%p3540_p0)
}
  0x26   :  { %28 = dma.hbm_to_vmem [thread:$0]  %s3792_s0, 448, %s26_s24, [#allocation3]  }
  0x27   :  { %s3552_s29 = scalar_lea.vmem %s48_s1, 64  ;;  %p3557_p2 = scmp.lt.s32.totalorder %s48_s1, %s48_s1 }
  0x28   :  { %p3553_p1 = scmp.ne.s32.totalorder %s48_s1, %s3552_s29  ;;  %p3558_p3 = scmp.lt.s32.totalorder %s3552_s29, %s3552_s29 }
  0x2a   :  { %p3559_p4 = por %p3558_p3, %p3557_p2 }
  0x2c   :  { %p3560_p5 = pnand %p3559_p4, %p3553_p1 }
  0x2e   :  { %3563 = shalt.err (!%p3560_p5)
}
  0x2f   :  { %50 = dma.hbm_to_vmem [thread:$0]  %s3794_s2, 64, %s48_s1, [#allocation6]  }
  0x30   :  { %s3642_s10 = smov [#allocation10]  }
  0x31   :  { %s70_s11 = sshll.u32 %s3642_s10, 4  ;;  %s71_s11 = int_to_ptr.vmem [resolvable:$true] %s70_s11 }
  0x32   :  { %s3572_s12 = scalar_lea.vmem %s71_s11, 2048  ;;  %p3577_p7 = scmp.lt.s32.totalorder %s71_s11, %s71_s11 }
  0x33   :  { %p3573_p6 = scmp.ne.s32.totalorder %s71_s11, %s3572_s12  ;;  %p3578_p8 = scmp.lt.s32.totalorder %s3572_s12, %s3572_s12 }
  0x35   :  { %p3579_p9 = por %p3578_p8, %p3577_p7 }
  0x37   :  { %p3580_p10 = pnand %p3579_p9, %p3573_p6 }
  0x39   :  { %3583 = shalt.err (!%p3580_p10)
}
  0x3a   :  { %s3643_s0 = smov 64   ;;  %s3644_s13 = smov 4  }
  0x3b   :  { %76 = dma.hbm_to_vmem [thread:$0]  %s3797_s5, 2048, %s71_s11, [#allocation9], %s3643_s0, %s3643_s0, %s3644_s13  }
  0x3c   :  { %s3645_s16 = smov [#allocation11]  }
  0x3d   :  { %s84_s17 = sshll.u32 %s3645_s16, 4  ;;  %s85_s17 = int_to_ptr.vmem [resolvable:$true] %s84_s17 }
  0x3e   :  { %s3592_s2 = scalar_lea.vmem %s85_s17, 1024  ;;  %p3597_p12 = scmp.lt.s32.totalorder %s85_s17, %s85_s17 }
  0x3f   :  { %p3593_p11 = scmp.ne.s32.totalorder %s85_s17, %s3592_s2  ;;  %p3598_p13 = scmp.lt.s32.totalorder %s3592_s2, %s3592_s2 }
  0x41   :  { %p3599_p0 = por %p3598_p13, %p3597_p12 }
  0x43   :  { %p3600_p1 = pnand %p3599_p0, %p3593_p11 }
  0x45   :  { %3603 = shalt.err (!%p3600_p1)
}
  0x46   :  { %90 = dma.hbm_to_vmem [thread:$0]  %s3799_s7, 1024, %s85_s17, [#allocation12], %s3643_s0, %s3643_s0, %s3644_s13  }
  0x47   :  { %3624 = dma.done.wait [#allocation3], 448  }
  0x48   :  { %3625 = vsyncadd [#allocation3], 4294966848 }
  0x49   :  { %3626 = dma.done.wait [#allocation6], 28736  }
  0x4a   :  { %3627 = vsyncadd [#allocation6], 4294938560 }
  0x4b   :  { %3628 = dma.done.wait [#allocation9], 10240  }
  0x4c   :  { %3629 = vsyncadd [#allocation9], 4294957056 }
  0x4d   :  { %3630 = dma.done.wait [#allocation12], 1024  }
  0x4e   :  { %3631 = vsyncadd [#allocation12], 4294966272  ;;  %v3021_v0 = vld [vmem:[#allocation5 + $0xe4] ss:$16 sps:$4 sm:$0xff]   ;;  %v3025_v2 = vld [vmem:[#allocation5 + $0xe0] ss:$16 sps:$4 sm:$0xff]  }
  0x4f   :  { %v3023_v1 = vld [vmem:[#allocation5 + $0x2e4] ss:$16 sps:$4 sm:$0xff]   ;;  %1507 = vmatprep.subr.bf16.mxu0 %v3021_v0  ;;  %v3026_v3 = vld [vmem:[#allocation5 + $0x2e0] ss:$16 sps:$4 sm:$0xff]   ;;  %vm3648_vm0 = vmmov 0   ;;  %s3649_s23 = smov [#allocation13]  }
  0x50   :  { %1548 = vmatprep.subr.bf16.mxu1 %v3023_v1  ;;  %v3027_v4 = vld [vmem:[#allocation5 + $0xc4] ss:$16 sps:$4 sm:$0xff]   ;;  %1508 = vmatpush1.bf16.msra.mxu0 %v3025_v2  ;;  %v3031_v6 = vld [vmem:[#allocation5 + $0xc0] ss:$16 sps:$4 sm:$0xff]   ;;  %s2621_s24 = sshll.u32 %s3649_s23, 4  ;;  %s2622_s24 = int_to_ptr.vmem [resolvable:$true] %s2621_s24 }
  0x51   :  { %1549 = vmatpush1.bf16.msra.mxu1 %v3026_v3  ;;  %v3029_v5 = vld [vmem:[#allocation5 + $0x2c4] ss:$16 sps:$4 sm:$0xff]   ;;  %1509 = vmatprep.subr.bf16.mxu0 %v3027_v4  ;;  %v3032_v7 = vld [vmem:[#allocation5 + $0x2c0] ss:$16 sps:$4 sm:$0xff]   ;;  %p3609_p3 = scmp.lt.s32.totalorder %s2622_s24, %s2622_s24 }
  0x52   :  { %1550 = vmatprep.subr.bf16.mxu1 %v3029_v5  ;;  %v3033_v8 = vld [vmem:[#allocation5 + $0xa4] ss:$16 sps:$4 sm:$0xff]   ;;  %v3037_v10 = vld [vmem:[#allocation5 + $0xa0] ss:$16 sps:$4 sm:$0xff]  }
  0x53   :  { %v3035_v9 = vld [vmem:[#allocation5 + $0x2a4] ss:$16 sps:$4 sm:$0xff]   ;;  %v3038_v11 = vld [vmem:[#allocation5 + $0x2a0] ss:$16 sps:$4 sm:$0xff]  }
  0x54   :  { %1510 = vmatpush1.bf16.msra.mxu0 %v3031_v6  ;;  %v3039_v12 = vld [vmem:[#allocation5 + $0x84] ss:$16 sps:$4 sm:$0xff]   ;;  %v3043_v14 = vld [vmem:[#allocation5 + $0x80] ss:$16 sps:$4 sm:$0xff]  }
  0x55   :  { %1551 = vmatpush1.bf16.msra.mxu1 %v3032_v7  ;;  %1511 = vmatprep.subr.bf16.mxu0 %v3033_v8  ;;  %v3041_v13 = vld [vmem:[#allocation5 + $0x284] ss:$16 sps:$4 sm:$0xff]   ;;  %v3044_v15 = vld [vmem:[#allocation5 + $0x280] ss:$16 sps:$4 sm:$0xff]  }
  0x56   :  { %1552 = vmatprep.subr.bf16.mxu1 %v3035_v9  ;;  %v3045_v16 = vld [vmem:[#allocation5 + $0x64] ss:$16 sps:$4 sm:$0xff]   ;;  %v3049_v18 = vld [vmem:[#allocation5 + $0x60] ss:$16 sps:$4 sm:$0xff]  }
  0x57   :  { %v3047_v17 = vld [vmem:[#allocation5 + $0x264] ss:$16 sps:$4 sm:$0xff]   ;;  %v3050_v19 = vld [vmem:[#allocation5 + $0x260] ss:$16 sps:$4 sm:$0xff]  }
  0x58   :  { %1512 = vmatpush1.bf16.msra.mxu0 %v3037_v10  ;;  %v3051_v20 = vld [vmem:[#allocation5 + $0x44] ss:$16 sps:$4 sm:$0xff]   ;;  %v3055_v22 = vld [vmem:[#allocation5 + $0x40] ss:$16 sps:$4 sm:$0xff]  }
  0x59   :  { %1553 = vmatpush1.bf16.msra.mxu1 %v3038_v11  ;;  %1513 = vmatprep.subr.bf16.mxu0 %v3039_v12  ;;  %v3053_v21 = vld [vmem:[#allocation5 + $0x244] ss:$16 sps:$4 sm:$0xff]   ;;  %v3056_v23 = vld [vmem:[#allocation5 + $0x240] ss:$16 sps:$4 sm:$0xff]  }
  0x5a   :  { %1554 = vmatprep.subr.bf16.mxu1 %v3041_v13  ;;  %v3057_v24 = vld [vmem:[#allocation5 + $0x24] ss:$16 sps:$4 sm:$0xff]   ;;  %v3061_v26 = vld [vmem:[#allocation5 + $0x20] ss:$16 sps:$4 sm:$0xff]  }
  0x5b   :  { %v3059_v25 = vld [vmem:[#allocation5 + $0x224] ss:$16 sps:$4 sm:$0xff]   ;;  %v3062_v27 = vld [vmem:[#allocation5 + $0x220] ss:$16 sps:$4 sm:$0xff]  }
  0x5c   :  { %1514 = vmatpush1.bf16.msra.mxu0 %v3043_v14  ;;  %v3063_v28 = vld [vmem:[#allocation5 + $0x4] ss:$16 sps:$4 sm:$0xff]   ;;  %v3067_v30 = vld [vmem:[#allocation5] ss:$16 sps:$4 sm:$0xff]  }
  0x5d   :  { %1555 = vmatpush1.bf16.msra.mxu1 %v3044_v15  ;;  %1515 = vmatprep.subr.bf16.mxu0 %v3045_v16  ;;  %v3065_v29 = vld [vmem:[#allocation5 + $0x204] ss:$16 sps:$4 sm:$0xff]   ;;  %v3068_v31 = vld [vmem:[#allocation5 + $0x200] ss:$16 sps:$4 sm:$0xff]   ;;  %v3646_v16 = vmov 0  }
  0x5e   :  { %1556 = vmatprep.subr.bf16.mxu1 %v3047_v17  ;;  %v3069_v32 = vld [vmem:[#allocation5 + $0x1e4] ss:$16 sps:$4 sm:$0xff]   ;;  %v3073_v34 = vld [vmem:[#allocation5 + $0x1e0] ss:$16 sps:$4 sm:$0xff]  }
  0x5f   :  { %v3071_v33 = vld [vmem:[#allocation5 + $0x3e4] ss:$16 sps:$4 sm:$0xff]   ;;  %v3074_v35 = vld [vmem:[#allocation5 + $0x3e0] ss:$16 sps:$4 sm:$0xff]  }
  0x60   :  { %1516 = vmatpush1.bf16.msra.mxu0 %v3049_v18  ;;  %v3075_v36 = vld [vmem:[#allocation5 + $0x1c4] ss:$16 sps:$4 sm:$0xff]   ;;  %v3079_v38 = vld [vmem:[#allocation5 + $0x1c0] ss:$16 sps:$4 sm:$0xff]  }
  0x61   :  { %1557 = vmatpush1.bf16.msra.mxu1 %v3050_v19  ;;  %1517 = vmatprep.subr.bf16.mxu0 %v3051_v20  ;;  %v3077_v37 = vld [vmem:[#allocation5 + $0x3c4] ss:$16 sps:$4 sm:$0xff]   ;;  %v3080_v39 = vld [vmem:[#allocation5 + $0x3c0] ss:$16 sps:$4 sm:$0xff]  }
  0x62   :  { %1558 = vmatprep.subr.bf16.mxu1 %v3053_v21  ;;  %v3081_v40 = vld [vmem:[#allocation5 + $0x1a4] ss:$16 sps:$4 sm:$0xff]   ;;  %v3085_v42 = vld [vmem:[#allocation5 + $0x1a0] ss:$16 sps:$4 sm:$0xff]  }
  0x63   :  { %v3083_v41 = vld [vmem:[#allocation5 + $0x3a4] ss:$16 sps:$4 sm:$0xff]   ;;  %v3086_v43 = vld [vmem:[#allocation5 + $0x3a0] ss:$16 sps:$4 sm:$0xff]  }
  0x64   :  { %1518 = vmatpush1.bf16.msra.mxu0 %v3055_v22  ;;  %v3087_v44 = vld [vmem:[#allocation5 + $0x184] ss:$16 sps:$4 sm:$0xff]   ;;  %v113_v48 = vld [vmem:[#allocation2 + $0x8] sm:$0xff] }
  0x65   :  { %1559 = vmatpush1.bf16.msra.mxu1 %v3056_v23  ;;  %1519 = vmatprep.subr.bf16.mxu0 %v3057_v24  ;;  %v3089_v45 = vld [vmem:[#allocation5 + $0x384] ss:$16 sps:$4 sm:$0xff]   ;;  %v3091_v49 = vld [vmem:[#allocation5 + $0x180] ss:$16 sps:$4 sm:$0xff]   ;;  %v3720_v51 = vcombine.high %v113_v48, %v113_v48  ;;  %v3726_v7 = vcombine.low %v113_v48, %v113_v48  ;;  %v3181_v48 = vld [vmem:[#allocation5 + $0xcc] ss:$16 sps:$4 sm:$0xff]  }
  0x66   :  { %1560 = vmatprep.subr.bf16.mxu1 %v3059_v25  ;;  %v112_v46 = vld [vmem:[#allocation2] sm:$0xff]  ;;  %v3092_v50 = vld [vmem:[#allocation5 + $0x380] ss:$16 sps:$4 sm:$0xff]  }
  0x67   :  { %v3718_v47 = vcombine.high %v112_v46, %v112_v46  ;;  %v3093_v52 = vld [vmem:[#allocation5 + $0x164] ss:$16 sps:$4 sm:$0xff]   ;;  %1580 = vmatprep.mubr.bf16.mxu1 %v3720_v51  ;;  %v3097_v54 = vld [vmem:[#allocation5 + $0x160] ss:$16 sps:$4 sm:$0xff]   ;;  %v3724_v6 = vcombine.low %v112_v46, %v112_v46 }
  0x68   :  { %1520 = vmatpush1.bf16.msra.mxu0 %v3061_v26  ;;  %v3095_v53 = vld [vmem:[#allocation5 + $0x364] ss:$16 sps:$4 sm:$0xff]   ;;  %v3098_v55 = vld [vmem:[#allocation5 + $0x360] ss:$16 sps:$4 sm:$0xff]  }
  0x69   :  { %1561 = vmatpush1.bf16.msra.mxu1 %v3062_v27  ;;  %1521 = vmatprep.subr.bf16.mxu0 %v3063_v28  ;;  %v3099_v56 = vld [vmem:[#allocation5 + $0x144] ss:$16 sps:$4 sm:$0xff]   ;;  %v3103_v58 = vld [vmem:[#allocation5 + $0x140] ss:$16 sps:$4 sm:$0xff]  }
  0x6a   :  { %1562 = vmatprep.subr.bf16.mxu1 %v3065_v29  ;;  %1539 = vmatprep.mubr.bf16.mxu0 %v3718_v47  ;;  %v3101_v57 = vld [vmem:[#allocation5 + $0x344] ss:$16 sps:$4 sm:$0xff]   ;;  %v3104_v59 = vld [vmem:[#allocation5 + $0x340] ss:$16 sps:$4 sm:$0xff]  }
  0x6b   :  { %v3105_v60 = vld [vmem:[#allocation5 + $0x124] ss:$16 sps:$4 sm:$0xff]   ;;  %v3109_v62 = vld [vmem:[#allocation5 + $0x120] ss:$16 sps:$4 sm:$0xff]  }
  0x6c   :  { %1522 = vmatpush1.bf16.msra.mxu0 %v3067_v30  ;;  %v3107_v61 = vld [vmem:[#allocation5 + $0x324] ss:$16 sps:$4 sm:$0xff]   ;;  %v3110_v63 = vld [vmem:[#allocation5 + $0x320] ss:$16 sps:$4 sm:$0xff]  }
  0x6d   :  { %1563 = vmatpush1.bf16.msra.mxu1 %v3068_v31  ;;  %1523 = vmatprep.subr.bf16.mxu0 %v3069_v32  ;;  %v3111_v0 = vld [vmem:[#allocation5 + $0x104] ss:$16 sps:$4 sm:$0xff]   ;;  %v3115_v2 = vld [vmem:[#allocation5 + $0x100] ss:$16 sps:$4 sm:$0xff]  }
  0x6e   :  { %1564 = vmatprep.subr.bf16.mxu1 %v3071_v33  ;;  %v3113_v1 = vld [vmem:[#allocation5 + $0x304] ss:$16 sps:$4 sm:$0xff]   ;;  %v3116_v3 = vld [vmem:[#allocation5 + $0x300] ss:$16 sps:$4 sm:$0xff]  }
  0x6f   :  { %v3123_v4 = vld [vmem:[#allocation5 + $0x4e4] ss:$16 sps:$4 sm:$0xff]   ;;  %v3121_v8 = vld [vmem:[#allocation5 + $0x4e0] ss:$16 sps:$4 sm:$0xff]  }
  0x70   :  { %1524 = vmatpush2.bf16.msra.mxu0 %v3073_v34  ;;  %v3126_v5 = vld [vmem:[#allocation5 + $0x6e4] ss:$16 sps:$4 sm:$0xff]   ;;  %v3124_v9 = vld [vmem:[#allocation5 + $0x6e0] ss:$16 sps:$4 sm:$0xff]  }
  0x71   :  { %1565 = vmatpush2.bf16.msra.mxu1 %v3074_v35  ;;  %1525 = vmatprep.subr.bf16.mxu0 %v3075_v36  ;;  %v3129_v10 = vld [vmem:[#allocation5 + $0x4c4] ss:$16 sps:$4 sm:$0xff]   ;;  %v3127_v12 = vld [vmem:[#allocation5 + $0x4c0] ss:$16 sps:$4 sm:$0xff]  }
  0x72   :  { %1566 = vmatprep.subr.bf16.mxu1 %v3077_v37  ;;  %v3132_v11 = vld [vmem:[#allocation5 + $0x6c4] ss:$16 sps:$4 sm:$0xff]   ;;  %v3130_v13 = vld [vmem:[#allocation5 + $0x6c0] ss:$16 sps:$4 sm:$0xff]  }
  0x73   :  { %v3135_v14 = vld [vmem:[#allocation5 + $0x4a4] ss:$16 sps:$4 sm:$0xff]   ;;  %v3133_v17 = vld [vmem:[#allocation5 + $0x4a0] ss:$16 sps:$4 sm:$0xff]  }
  0x74   :  { %1526 = vmatpush2.bf16.msra.mxu0 %v3079_v38  ;;  %v3138_v15 = vld [vmem:[#allocation5 + $0x6a4] ss:$16 sps:$4 sm:$0xff]   ;;  %v3136_v18 = vld [vmem:[#allocation5 + $0x6a0] ss:$16 sps:$4 sm:$0xff]  }
  0x75   :  { %1567 = vmatpush2.bf16.msra.mxu1 %v3080_v39  ;;  %1527 = vmatprep.subr.bf16.mxu0 %v3081_v40  ;;  %v3141_v19 = vld [vmem:[#allocation5 + $0x484] ss:$16 sps:$4 sm:$0xff]   ;;  %v3139_v21 = vld [vmem:[#allocation5 + $0x480] ss:$16 sps:$4 sm:$0xff]  }
  0x76   :  { %1568 = vmatprep.subr.bf16.mxu1 %v3083_v41  ;;  %v3144_v20 = vld [vmem:[#allocation5 + $0x684] ss:$16 sps:$4 sm:$0xff]   ;;  %v3142_v22 = vld [vmem:[#allocation5 + $0x680] ss:$16 sps:$4 sm:$0xff]  }
  0x77   :  { %v3147_v23 = vld [vmem:[#allocation5 + $0x464] ss:$16 sps:$4 sm:$0xff]   ;;  %v3145_v25 = vld [vmem:[#allocation5 + $0x460] ss:$16 sps:$4 sm:$0xff]  }
  0x78   :  { %1528 = vmatpush2.bf16.msra.mxu0 %v3085_v42  ;;  %v3150_v24 = vld [vmem:[#allocation5 + $0x664] ss:$16 sps:$4 sm:$0xff]   ;;  %v3148_v26 = vld [vmem:[#allocation5 + $0x660] ss:$16 sps:$4 sm:$0xff]   ;;  %v3175_v42 = vld [vmem:[#allocation5 + $0xec] ss:$16 sps:$4 sm:$0xff]  }
  0x79   :  { %1569 = vmatpush2.bf16.msra.mxu1 %v3086_v43  ;;  %1529 = vmatprep.subr.bf16.mxu0 %v3087_v44  ;;  %v3153_v27 = vld [vmem:[#allocation5 + $0x444] ss:$16 sps:$4 sm:$0xff]   ;;  %v3151_v29 = vld [vmem:[#allocation5 + $0x440] ss:$16 sps:$4 sm:$0xff]   ;;  %v3738_v44 = vld [vmem:[#allocation2 + $0x18] ss:$0 sps:$4 sm:$0xff]  }
  0x7a   :  { %1570 = vmatprep.subr.bf16.mxu1 %v3089_v45  ;;  %v3156_v28 = vld [vmem:[#allocation5 + $0x644] ss:$16 sps:$4 sm:$0xff]   ;;  %v3154_v30 = vld [vmem:[#allocation5 + $0x640] ss:$16 sps:$4 sm:$0xff]   ;;  %v3173_v45 = vld [vmem:[#allocation5 + $0xe8] ss:$16 sps:$4 sm:$0xff]  }
  0x7b   :  { %v3159_v31 = vld [vmem:[#allocation5 + $0x424] ss:$16 sps:$4 sm:$0xff]   ;;  %v3157_v34 = vld [vmem:[#allocation5 + $0x420] ss:$16 sps:$4 sm:$0xff]  }
  0x7c   :  { %1530 = vmatpush2.bf16.msra.mxu0 %v3091_v49  ;;  %v3162_v32 = vld [vmem:[#allocation5 + $0x624] ss:$16 sps:$4 sm:$0xff]   ;;  %v3160_v36 = vld [vmem:[#allocation5 + $0x620] ss:$16 sps:$4 sm:$0xff]  }
  0x7d   :  { %1571 = vmatpush2.bf16.msra.mxu1 %v3092_v50  ;;  %1531 = vmatprep.subr.bf16.mxu0 %v3093_v52  ;;  %v3731_v33 = vld [vmem:[#allocation2 + $0x10] sm:$0xff]  ;;  %v3163_v39 = vld [vmem:[#allocation5 + $0x400] ss:$16 sps:$4 sm:$0xff]  }
  0x7e   :  { %1572 = vmatprep.subr.bf16.mxu1 %v3095_v53  ;;  %v3735_v35 = vcombine.high %v3731_v33, %v3731_v33  ;;  %v3165_v37 = vld [vmem:[#allocation5 + $0x404] ss:$16 sps:$4 sm:$0xff]   ;;  %v3166_v40 = vld [vmem:[#allocation5 + $0x600] ss:$16 sps:$4 sm:$0xff]   ;;  %v3179_v50 = vld [vmem:[#allocation5 + $0xc8] ss:$16 sps:$4 sm:$0xff]  }
  0x7f   :  { %v3168_v38 = vld [vmem:[#allocation5 + $0x604] ss:$16 sps:$4 sm:$0xff]   ;;  %v3169_v43 = vld [vmem:[#allocation5 + $0x5e0] ss:$16 sps:$4 sm:$0xff]   ;;  %v3187_v53 = vld [vmem:[#allocation5 + $0xac] ss:$16 sps:$4 sm:$0xff]  }
  0x80   :  { %1532 = vmatpush2.bf16.msra.mxu0 %v3097_v54  ;;  %v3171_v41 = vld [vmem:[#allocation5 + $0x5e4] ss:$16 sps:$4 sm:$0xff]   ;;  %v3176_v49 = vld [vmem:[#allocation5 + $0x5c0] ss:$16 sps:$4 sm:$0xff]  }
  0x81   :  { %1573 = vmatpush2.bf16.msra.mxu1 %v3098_v55  ;;  %1533 = vmatprep.subr.bf16.mxu0 %v3099_v56  ;;  %v3178_v46 = vld [vmem:[#allocation5 + $0x5c4] ss:$16 sps:$4 sm:$0xff]   ;;  %v3182_v54 = vld [vmem:[#allocation5 + $0x5a0] ss:$16 sps:$4 sm:$0xff]   ;;  %v3185_v55 = vld [vmem:[#allocation5 + $0xa8] ss:$16 sps:$4 sm:$0xff]  }
  0x82   :  { %1574 = vmatprep.subr.bf16.mxu1 %v3101_v57  ;;  %v3184_v52 = vld [vmem:[#allocation5 + $0x5a4] ss:$16 sps:$4 sm:$0xff]   ;;  %v3193_v57 = vld [vmem:[#allocation5 + $0x8c] ss:$16 sps:$4 sm:$0xff]  }
  0x83   :  { %v3190_v56 = vld [vmem:[#allocation5 + $0x584] ss:$16 sps:$4 sm:$0xff]  }
  0x84   :  { %1534 = vmatpush2.bf16.msra.mxu0 %v3103_v58  ;;  %v3188_v58 = vld [vmem:[#allocation5 + $0x580] ss:$16 sps:$4 sm:$0xff]  }
  0x85   :  { %1575 = vmatpush2.bf16.msra.mxu1 %v3104_v59  ;;  %1535 = vmatprep.subr.bf16.mxu0 %v3105_v60  ;;  %v3191_v59 = vld [vmem:[#allocation5 + $0x88] ss:$16 sps:$4 sm:$0xff]   ;;  %v3196_v60 = vld [vmem:[#allocation5 + $0x564] ss:$16 sps:$4 sm:$0xff]  }
  0x86   :  { %1576 = vmatprep.subr.bf16.mxu1 %v3107_v61  ;;  %v3199_v61 = vld [vmem:[#allocation5 + $0x6c] ss:$16 sps:$4 sm:$0xff]  }
  0x88   :  { %1536 = vmatpush2.bf16.msra.mxu0 %v3109_v62  ;;  %v3194_v62 = vld [vmem:[#allocation5 + $0x560] ss:$16 sps:$4 sm:$0xff]  }
  0x89   :  { %1577 = vmatpush2.bf16.msra.mxu1 %v3110_v63  ;;  %1537 = vmatprep.subr.bf16.mxu0 %v3111_v0  ;;  %v3202_v63 = vld [vmem:[#allocation5 + $0x544] ss:$16 sps:$4 sm:$0xff]   ;;  %v3205_v0 = vld [vmem:[#allocation5 + $0x4c] ss:$16 sps:$4 sm:$0xff]  }
  0x8a   :  { %1578 = vmatprep.subr.bf16.mxu1 %v3113_v1  ;;  %v3200_v1 = vld [vmem:[#allocation5 + $0x540] ss:$16 sps:$4 sm:$0xff]  }
  0x8c   :  { %1538 = vmatpush2.bf16.msra.mxu0 %v3115_v2  ;;  %v3203_v2 = vld [vmem:[#allocation5 + $0x48] ss:$16 sps:$4 sm:$0xff]  }
  0x8d   :  { %1579 = vmatpush2.bf16.msra.mxu1 %v3116_v3  ;;  %1589 = vmatprep.subr.bf16.mxu0 %v3123_v4  ;;  %v3208_v3 = vld [vmem:[#allocation5 + $0x524] ss:$16 sps:$4 sm:$0xff]   ;;  %v3211_v4 = vld [vmem:[#allocation5 + $0x2c] ss:$16 sps:$4 sm:$0xff]  }
  0x8e   :  { %1630 = vmatprep.subr.bf16.mxu1 %v3126_v5  ;;  %v3206_v5 = vld [vmem:[#allocation5 + $0x520] ss:$16 sps:$4 sm:$0xff]  }
  0x8f   :  { %1540 = vmatmul.mubr.bf16.vlgmr.msra.gmra.mxu0 %v3724_v6 }
  0x90   :  { %1581 = vmatmul.mubr.bf16.vlgmr.msra.gmra.mxu1 %v3726_v7  ;;  %1590 = vmatpush1.bf16.msra.mxu0 %v3121_v8  ;;  %v3209_v8 = vld [vmem:[#allocation5 + $0x28] ss:$16 sps:$4 sm:$0xff]  }
  0x91   :  { %1631 = vmatpush1.bf16.msra.mxu1 %v3124_v9  ;;  %1591 = vmatprep.subr.bf16.mxu0 %v3129_v10  ;;  %v3214_v9 = vld [vmem:[#allocation5 + $0x504] ss:$16 sps:$4 sm:$0xff]   ;;  %v3217_v10 = vld [vmem:[#allocation5 + $0xc] ss:$16 sps:$4 sm:$0xff]  }
  0x92   :  { %1632 = vmatprep.subr.bf16.mxu1 %v3132_v11  ;;  %1662 = vmatprep.mubr.bf16.mxu1 %v3646_v16  ;;  %v3212_v11 = vld [vmem:[#allocation5 + $0x500] ss:$16 sps:$4 sm:$0xff]  }
  0x93   :  { %1621 = vmatprep.mubr.bf16.mxu0 %v3735_v35 }
  0x94   :  { %1592 = vmatpush1.bf16.msra.mxu0 %v3127_v12  ;;  %v3215_v12 = vld [vmem:[#allocation5 + $0x8] ss:$16 sps:$4 sm:$0xff]  }
  0x95   :  { %1633 = vmatpush1.bf16.msra.mxu1 %v3130_v13  ;;  %1593 = vmatprep.subr.bf16.mxu0 %v3135_v14  ;;  %v3222_v13 = vld [vmem:[#allocation5 + $0x1ec] ss:$16 sps:$4 sm:$0xff]  }
  0x96   :  { %1634 = vmatprep.subr.bf16.mxu1 %v3138_v15  ;;  %v3225_v14 = vld [vmem:[#allocation5 + $0x2ec] ss:$16 sps:$4 sm:$0xff]   ;;  %v3744_v15 = vcombine.low %v3731_v33, %v3731_v33  ;;  %v3244_v33 = vld [vmem:[#allocation5 + $0x168] ss:$16 sps:$4 sm:$0xff]  }
  0x98   :  { %1594 = vmatpush1.bf16.msra.mxu0 %v3133_v17  ;;  %v3220_v17 = vld [vmem:[#allocation5 + $0x1e8] ss:$16 sps:$4 sm:$0xff]  }
  0x99   :  { %1635 = vmatpush1.bf16.msra.mxu1 %v3136_v18  ;;  %1595 = vmatprep.subr.bf16.mxu0 %v3141_v19  ;;  %v3223_v18 = vld [vmem:[#allocation5 + $0x2e8] ss:$16 sps:$4 sm:$0xff]   ;;  %v3228_v19 = vld [vmem:[#allocation5 + $0x1cc] ss:$16 sps:$4 sm:$0xff]  }
  0x9a   :  { %1636 = vmatprep.subr.bf16.mxu1 %v3144_v20  ;;  %v3231_v20 = vld [vmem:[#allocation5 + $0x2cc] ss:$16 sps:$4 sm:$0xff]  }
  0x9c   :  { %1596 = vmatpush1.bf16.msra.mxu0 %v3139_v21  ;;  %v3226_v21 = vld [vmem:[#allocation5 + $0x1c8] ss:$16 sps:$4 sm:$0xff]  }
  0x9d   :  { %1637 = vmatpush1.bf16.msra.mxu1 %v3142_v22  ;;  %1597 = vmatprep.subr.bf16.mxu0 %v3147_v23  ;;  %v3229_v22 = vld [vmem:[#allocation5 + $0x2c8] ss:$16 sps:$4 sm:$0xff]   ;;  %v3234_v23 = vld [vmem:[#allocation5 + $0x1ac] ss:$16 sps:$4 sm:$0xff]  }
  0x9e   :  { %1638 = vmatprep.subr.bf16.mxu1 %v3150_v24  ;;  %v3237_v24 = vld [vmem:[#allocation5 + $0x2ac] ss:$16 sps:$4 sm:$0xff]  }
  0xa0   :  { %1598 = vmatpush1.bf16.msra.mxu0 %v3145_v25  ;;  %v3232_v25 = vld [vmem:[#allocation5 + $0x1a8] ss:$16 sps:$4 sm:$0xff]  }
  0xa1   :  { %1639 = vmatpush1.bf16.msra.mxu1 %v3148_v26  ;;  %1599 = vmatprep.subr.bf16.mxu0 %v3153_v27  ;;  %v3235_v26 = vld [vmem:[#allocation5 + $0x2a8] ss:$16 sps:$4 sm:$0xff]   ;;  %v3240_v27 = vld [vmem:[#allocation5 + $0x18c] ss:$16 sps:$4 sm:$0xff]  }
  0xa2   :  { %1640 = vmatprep.subr.bf16.mxu1 %v3156_v28  ;;  %v3243_v28 = vld [vmem:[#allocation5 + $0x28c] ss:$16 sps:$4 sm:$0xff]  }
  0xa4   :  { %1600 = vmatpush1.bf16.msra.mxu0 %v3151_v29  ;;  %v3238_v29 = vld [vmem:[#allocation5 + $0x188] ss:$16 sps:$4 sm:$0xff]  }
  0xa5   :  { %1641 = vmatpush1.bf16.msra.mxu1 %v3154_v30  ;;  %1601 = vmatprep.subr.bf16.mxu0 %v3159_v31  ;;  %v3241_v30 = vld [vmem:[#allocation5 + $0x288] ss:$16 sps:$4 sm:$0xff]   ;;  %v3246_v31 = vld [vmem:[#allocation5 + $0x16c] ss:$16 sps:$4 sm:$0xff]  }
  0xa6   :  { %1642 = vmatprep.subr.bf16.mxu1 %v3162_v32  ;;  %v3249_v32 = vld [vmem:[#allocation5 + $0x26c] ss:$16 sps:$4 sm:$0xff]  }
  0xa8   :  { %1602 = vmatpush1.bf16.msra.mxu0 %v3157_v34  ;;  %v3252_v34 = vld [vmem:[#allocation5 + $0x14c] ss:$16 sps:$4 sm:$0xff]  }
  0xa9   :  { %1643 = vmatpush1.bf16.msra.mxu1 %v3160_v36  ;;  %1603 = vmatprep.subr.bf16.mxu0 %v3165_v37  ;;  %v3255_v36 = vld [vmem:[#allocation5 + $0x24c] ss:$16 sps:$4 sm:$0xff]   ;;  %v3250_v37 = vld [vmem:[#allocation5 + $0x148] ss:$16 sps:$4 sm:$0xff]  }
  0xaa   :  { %1644 = vmatprep.subr.bf16.mxu1 %v3168_v38  ;;  %v3253_v38 = vld [vmem:[#allocation5 + $0x248] ss:$16 sps:$4 sm:$0xff]  }
  0xac   :  { %1604 = vmatpush1.bf16.msra.mxu0 %v3163_v39  ;;  %v3258_v39 = vld [vmem:[#allocation5 + $0x12c] ss:$16 sps:$4 sm:$0xff]  }
  0xad   :  { %1645 = vmatpush1.bf16.msra.mxu1 %v3166_v40  ;;  %1605 = vmatprep.subr.bf16.mxu0 %v3171_v41  ;;  %v3261_v40 = vld [vmem:[#allocation5 + $0x22c] ss:$16 sps:$4 sm:$0xff]   ;;  %v3256_v41 = vld [vmem:[#allocation5 + $0x128] ss:$16 sps:$4 sm:$0xff]  }
  0xae   :  { %1671 = vmatprep.subr.bf16.mxu1 %v3175_v42  ;;  %v3259_v42 = vld [vmem:[#allocation5 + $0x228] ss:$16 sps:$4 sm:$0xff]  }
  0xb0   :  { %1663 = vmatmul.mubr.bf16.vlgmr.msra.gmra.mxu1 %v3738_v44  ;;  %1606 = vmatpush2.bf16.msra.mxu0 %v3169_v43  ;;  %v3264_v43 = vld [vmem:[#allocation5 + $0x10c] ss:$16 sps:$4 sm:$0xff]  }
  0xb1   :  { %1672 = vmatpush1.bf16.msra.mxu1 %v3173_v45  ;;  %1607 = vmatprep.subr.bf16.mxu0 %v3178_v46  ;;  %v3267_v45 = vld [vmem:[#allocation5 + $0x20c] ss:$16 sps:$4 sm:$0xff]   ;;  %v3262_v46 = vld [vmem:[#allocation5 + $0x108] ss:$16 sps:$4 sm:$0xff]  }
  0xb2   :  { %1673 = vmatprep.subr.bf16.mxu1 %v3181_v48  ;;  %1703 = vmatprep.mubr.bf16.mxu1 %v3718_v47  ;;  %v3197_v47 = vld [vmem:[#allocation5 + $0x68] ss:$16 sps:$4 sm:$0xff]  }
  0xb3   :  { %v3265_v48 = vld [vmem:[#allocation5 + $0x208] ss:$16 sps:$4 sm:$0xff]  }
  0xb4   :  { %1608 = vmatpush2.bf16.msra.mxu0 %v3176_v49  ;;  %v3270_v49 = vld [vmem:[#allocation5 + $0x3ec] ss:$16 sps:$4 sm:$0xff]  }
  0xb5   :  { %1674 = vmatpush1.bf16.msra.mxu1 %v3179_v50  ;;  %1609 = vmatprep.subr.bf16.mxu0 %v3184_v52  ;;  %v3273_v50 = vld [vmem:[#allocation5 + $0x4ec] ss:$16 sps:$4 sm:$0xff]   ;;  %v3268_v52 = vld [vmem:[#allocation5 + $0x3e8] ss:$16 sps:$4 sm:$0xff]  }
  0xb6   :  { %1675 = vmatprep.subr.bf16.mxu1 %v3187_v53  ;;  %v3271_v53 = vld [vmem:[#allocation5 + $0x4e8] ss:$16 sps:$4 sm:$0xff]  }
  0xb8   :  { %1610 = vmatpush2.bf16.msra.mxu0 %v3182_v54  ;;  %v3276_v54 = vld [vmem:[#allocation5 + $0x3cc] ss:$16 sps:$4 sm:$0xff]  }
  0xb9   :  { %1676 = vmatpush1.bf16.msra.mxu1 %v3185_v55  ;;  %1611 = vmatprep.subr.bf16.mxu0 %v3190_v56  ;;  %v3279_v55 = vld [vmem:[#allocation5 + $0x4cc] ss:$16 sps:$4 sm:$0xff]   ;;  %v3274_v56 = vld [vmem:[#allocation5 + $0x3c8] ss:$16 sps:$4 sm:$0xff]  }
  0xba   :  { %1677 = vmatprep.subr.bf16.mxu1 %v3193_v57  ;;  %v3277_v57 = vld [vmem:[#allocation5 + $0x4c8] ss:$16 sps:$4 sm:$0xff]  }
  0xbc   :  { %1612 = vmatpush2.bf16.msra.mxu0 %v3188_v58  ;;  %v3282_v58 = vld [vmem:[#allocation5 + $0x3ac] ss:$16 sps:$4 sm:$0xff]  }
  0xbd   :  { %1678 = vmatpush1.bf16.msra.mxu1 %v3191_v59  ;;  %1613 = vmatprep.subr.bf16.mxu0 %v3196_v60  ;;  %v3285_v59 = vld [vmem:[#allocation5 + $0x4ac] ss:$16 sps:$4 sm:$0xff]   ;;  %v3280_v60 = vld [vmem:[#allocation5 + $0x3a8] ss:$16 sps:$4 sm:$0xff]  }
  0xbe   :  { %1679 = vmatprep.subr.bf16.mxu1 %v3199_v61  ;;  %v3283_v61 = vld [vmem:[#allocation5 + $0x4a8] ss:$16 sps:$4 sm:$0xff]  }
  0xc0   :  { %1614 = vmatpush2.bf16.msra.mxu0 %v3194_v62  ;;  %v3288_v62 = vld [vmem:[#allocation5 + $0x38c] ss:$16 sps:$4 sm:$0xff]  }
  0xc1   :  { %1680 = vmatpush1.bf16.msra.mxu1 %v3197_v47  ;;  %1615 = vmatprep.subr.bf16.mxu0 %v3202_v63  ;;  %v3291_v47 = vld [vmem:[#allocation5 + $0x48c] ss:$16 sps:$4 sm:$0xff]   ;;  %v3286_v63 = vld [vmem:[#allocation5 + $0x388] ss:$16 sps:$4 sm:$0xff]  }
  0xc2   :  { %1681 = vmatprep.subr.bf16.mxu1 %v3205_v0  ;;  %v3294_v0 = vld [vmem:[#allocation5 + $0x36c] ss:$16 sps:$4 sm:$0xff]  }
  0xc4   :  { %1616 = vmatpush2.bf16.msra.mxu0 %v3200_v1  ;;  %v3297_v1 = vld [vmem:[#allocation5 + $0x46c] ss:$16 sps:$4 sm:$0xff]  }
  0xc5   :  { %1682 = vmatpush1.bf16.msra.mxu1 %v3203_v2  ;;  %1617 = vmatprep.subr.bf16.mxu0 %v3208_v3  ;;  %v3292_v2 = vld [vmem:[#allocation5 + $0x368] ss:$16 sps:$4 sm:$0xff]  }
  0xc6   :  { %1683 = vmatprep.subr.bf16.mxu1 %v3211_v4  ;;  %v3295_v3 = vld [vmem:[#allocation5 + $0x468] ss:$16 sps:$4 sm:$0xff]   ;;  %v3300_v4 = vld [vmem:[#allocation5 + $0x34c] ss:$16 sps:$4 sm:$0xff]  }
  0xc8   :  { %1618 = vmatpush2.bf16.msra.mxu0 %v3206_v5  ;;  %v3303_v5 = vld [vmem:[#allocation5 + $0x44c] ss:$16 sps:$4 sm:$0xff]  }
  0xc9   :  { %1684 = vmatpush1.bf16.msra.mxu1 %v3209_v8  ;;  %1619 = vmatprep.subr.bf16.mxu0 %v3214_v9  ;;  %v3301_v8 = vld [vmem:[#allocation5 + $0x448] ss:$16 sps:$4 sm:$0xff]   ;;  %v3306_v9 = vld [vmem:[#allocation5 + $0x32c] ss:$16 sps:$4 sm:$0xff]  }
  0xca   :  { %1685 = vmatprep.subr.bf16.mxu1 %v3217_v10  ;;  %v3309_v10 = vld [vmem:[#allocation5 + $0x42c] ss:$16 sps:$4 sm:$0xff]  }
  0xcc   :  { %1620 = vmatpush2.bf16.msra.mxu0 %v3212_v11  ;;  %v3304_v11 = vld [vmem:[#allocation5 + $0x328] ss:$16 sps:$4 sm:$0xff]  }
  0xcd   :  { %1686 = vmatpush1.bf16.msra.mxu1 %v3215_v12  ;;  %1712 = vmatprep.subr.bf16.mxu0 %v3225_v14  ;;  %v3307_v12 = vld [vmem:[#allocation5 + $0x428] ss:$16 sps:$4 sm:$0xff]   ;;  %v3315_v14 = vld [vmem:[#allocation5 + $0x40c] ss:$16 sps:$4 sm:$0xff]  }
  0xce   :  { %1687 = vmatprep.subr.bf16.mxu1 %v3222_v13  ;;  %v3312_v13 = vld [vmem:[#allocation5 + $0x30c] ss:$16 sps:$4 sm:$0xff]  }
  0xcf   :  { %1622 = vmatmul.mubr.bf16.vlgmr.msra.gmra.mxu0 %v3744_v15 }
  0xd0   :  { %1713 = vmatpush1.bf16.msra.mxu0 %v3223_v18  ;;  %1744 = vmatprep.mubr.bf16.mxu0 %v3720_v51  ;;  %v3247_v51 = vld [vmem:[#allocation5 + $0x268] ss:$16 sps:$4 sm:$0xff]  }
  0xd1   :  { %1688 = vmatpush2.bf16.msra.mxu1 %v3220_v17  ;;  %1714 = vmatprep.subr.bf16.mxu0 %v3231_v20  ;;  %v3310_v17 = vld [vmem:[#allocation5 + $0x308] ss:$16 sps:$4 sm:$0xff]   ;;  %v3321_v20 = vld [vmem:[#allocation5 + $0x6ec] ss:$16 sps:$4 sm:$0xff]  }
  0xd2   :  { %1689 = vmatprep.subr.bf16.mxu1 %v3228_v19  ;;  %v3313_v18 = vld [vmem:[#allocation5 + $0x408] ss:$16 sps:$4 sm:$0xff]   ;;  %v3318_v19 = vld [vmem:[#allocation5 + $0x5ec] ss:$16 sps:$4 sm:$0xff]  }
  0xd4   :  { %1715 = vmatpush1.bf16.msra.mxu0 %v3229_v22  ;;  %v3319_v22 = vld [vmem:[#allocation5 + $0x6e8] ss:$16 sps:$4 sm:$0xff]  }
  0xd5   :  { %1690 = vmatpush2.bf16.msra.mxu1 %v3226_v21  ;;  %1716 = vmatprep.subr.bf16.mxu0 %v3237_v24  ;;  %v3316_v21 = vld [vmem:[#allocation5 + $0x5e8] ss:$16 sps:$4 sm:$0xff]   ;;  %v3327_v24 = vld [vmem:[#allocation5 + $0x6cc] ss:$16 sps:$4 sm:$0xff]  }
  0xd6   :  { %1691 = vmatprep.subr.bf16.mxu1 %v3234_v23  ;;  %v3324_v23 = vld [vmem:[#allocation5 + $0x5cc] ss:$16 sps:$4 sm:$0xff]  }
  0xd8   :  { %1717 = vmatpush1.bf16.msra.mxu0 %v3235_v26  ;;  %v3325_v26 = vld [vmem:[#allocation5 + $0x6c8] ss:$16 sps:$4 sm:$0xff]  }
  0xd9   :  { %1692 = vmatpush2.bf16.msra.mxu1 %v3232_v25  ;;  %1718 = vmatprep.subr.bf16.mxu0 %v3243_v28  ;;  %v3322_v25 = vld [vmem:[#allocation5 + $0x5c8] ss:$16 sps:$4 sm:$0xff]   ;;  %v3333_v28 = vld [vmem:[#allocation5 + $0x6ac] ss:$16 sps:$4 sm:$0xff]  }
  0xda   :  { %1693 = vmatprep.subr.bf16.mxu1 %v3240_v27  ;;  %v3330_v27 = vld [vmem:[#allocation5 + $0x5ac] ss:$16 sps:$4 sm:$0xff]  }
  0xdc   :  { %1719 = vmatpush1.bf16.msra.mxu0 %v3241_v30  ;;  %v3331_v30 = vld [vmem:[#allocation5 + $0x6a8] ss:$16 sps:$4 sm:$0xff]  }
  0xdd   :  { %1694 = vmatpush2.bf16.msra.mxu1 %v3238_v29  ;;  %1720 = vmatprep.subr.bf16.mxu0 %v3249_v32  ;;  %v3328_v29 = vld [vmem:[#allocation5 + $0x5a8] ss:$16 sps:$4 sm:$0xff]   ;;  %v3339_v32 = vld [vmem:[#allocation5 + $0x68c] ss:$16 sps:$4 sm:$0xff]  }
  0xde   :  { %1695 = vmatprep.subr.bf16.mxu1 %v3246_v31  ;;  %v3336_v31 = vld [vmem:[#allocation5 + $0x58c] ss:$16 sps:$4 sm:$0xff]  }
  0xe0   :  { %1721 = vmatpush1.bf16.msra.mxu0 %v3247_v51  ;;  %v3342_v51 = vld [vmem:[#allocation5 + $0x56c] ss:$16 sps:$4 sm:$0xff]  }
  0xe1   :  { %1696 = vmatpush2.bf16.msra.mxu1 %v3244_v33  ;;  %1722 = vmatprep.subr.bf16.mxu0 %v3255_v36  ;;  %v3334_v33 = vld [vmem:[#allocation5 + $0x588] ss:$16 sps:$4 sm:$0xff]  }
  0xe2   :  { %1697 = vmatprep.subr.bf16.mxu1 %v3252_v34  ;;  %v3345_v34 = vld [vmem:[#allocation5 + $0x66c] ss:$16 sps:$4 sm:$0xff]   ;;  %v3340_v36 = vld [vmem:[#allocation5 + $0x568] ss:$16 sps:$4 sm:$0xff]  }
  0xe4   :  { %1723 = vmatpush1.bf16.msra.mxu0 %v3253_v38  ;;  %v3351_v38 = vld [vmem:[#allocation5 + $0x64c] ss:$16 sps:$4 sm:$0xff]  }
  0xe5   :  { %1698 = vmatpush2.bf16.msra.mxu1 %v3250_v37  ;;  %1724 = vmatprep.subr.bf16.mxu0 %v3261_v40  ;;  %v3348_v37 = vld [vmem:[#allocation5 + $0x54c] ss:$16 sps:$4 sm:$0xff]   ;;  %v3349_v40 = vld [vmem:[#allocation5 + $0x648] ss:$16 sps:$4 sm:$0xff]  }
  0xe6   :  { %1699 = vmatprep.subr.bf16.mxu1 %v3258_v39  ;;  %v3346_v39 = vld [vmem:[#allocation5 + $0x548] ss:$16 sps:$4 sm:$0xff]  }
  0xe8   :  { %1725 = vmatpush1.bf16.msra.mxu0 %v3259_v42  ;;  %v3357_v42 = vld [vmem:[#allocation5 + $0x62c] ss:$16 sps:$4 sm:$0xff]  }
  0xe9   :  { %1700 = vmatpush2.bf16.msra.mxu1 %v3256_v41  ;;  %1726 = vmatprep.subr.bf16.mxu0 %v3267_v45  ;;  %v3354_v41 = vld [vmem:[#allocation5 + $0x52c] ss:$16 sps:$4 sm:$0xff]   ;;  %v3355_v45 = vld [vmem:[#allocation5 + $0x628] ss:$16 sps:$4 sm:$0xff]  }
  0xea   :  { %1701 = vmatprep.subr.bf16.mxu1 %v3264_v43  ;;  %v3352_v43 = vld [vmem:[#allocation5 + $0x528] ss:$16 sps:$4 sm:$0xff]  }
  0xec   :  { %1727 = vmatpush1.bf16.msra.mxu0 %v3265_v48  ;;  %v3363_v48 = vld [vmem:[#allocation5 + $0x60c] ss:$16 sps:$4 sm:$0xff]  }
  0xed   :  { %1702 = vmatpush2.bf16.msra.mxu1 %v3262_v46  ;;  %1728 = vmatprep.subr.bf16.mxu0 %v3270_v49  ;;  %v3360_v46 = vld [vmem:[#allocation5 + $0x50c] ss:$16 sps:$4 sm:$0xff]   ;;  %v3358_v49 = vld [vmem:[#allocation5 + $0x508] ss:$16 sps:$4 sm:$0xff]  }
  0xee   :  { %1753 = vmatprep.subr.bf16.mxu1 %v3273_v50  ;;  %v3361_v50 = vld [vmem:[#allocation5 + $0x608] ss:$16 sps:$4 sm:$0xff]  }
  0xf0   :  { %1704 = vmatmul.mubr.bf16.vlgmr.msra.gmra.mxu1 %v3724_v6  ;;  %1729 = vmatpush2.bf16.msra.mxu0 %v3268_v52  ;;  %v3289_v6 = vld [vmem:[#allocation5 + $0x488] ss:$16 sps:$4 sm:$0xff]  }
  0xf1   :  { %1754 = vmatpush1.bf16.msra.mxu1 %v3271_v53  ;;  %1730 = vmatprep.subr.bf16.mxu0 %v3276_v54  ;;  %v3366_v52 = vld [vmem:[#allocation8 + $0x74] ss:$8 sps:$4 sm:$0xff]   ;;  %v3364_v53 = vld [vmem:[#allocation8 + $0x70] ss:$8 sps:$4 sm:$0xff]   ;;  %v3369_v54 = vld [vmem:[#allocation8 + $0x64] ss:$8 sps:$4 sm:$0xff]  }
  0xf2   :  { %1755 = vmatprep.subr.bf16.mxu1 %v3279_v55  ;;  %1785 = vmatprep.mubr.bf16.mxu1 %v3735_v35  ;;  %v3298_v35 = vld [vmem:[#allocation5 + $0x348] ss:$16 sps:$4 sm:$0xff]   ;;  %v3367_v55 = vld [vmem:[#allocation8 + $0x60] ss:$8 sps:$4 sm:$0xff]  }
  0xf4   :  { %1731 = vmatpush2.bf16.msra.mxu0 %v3274_v56  ;;  %v3372_v56 = vld [vmem:[#allocation8 + $0x54] ss:$8 sps:$4 sm:$0xff]  }
  0xf5   :  { %1756 = vmatpush1.bf16.msra.mxu1 %v3277_v57  ;;  %1732 = vmatprep.subr.bf16.mxu0 %v3282_v58  ;;  %v3370_v57 = vld [vmem:[#allocation8 + $0x50] ss:$8 sps:$4 sm:$0xff]   ;;  %v3375_v58 = vld [vmem:[#allocation8 + $0x44] ss:$8 sps:$4 sm:$0xff]  }
  0xf6   :  { %1757 = vmatprep.subr.bf16.mxu1 %v3285_v59  ;;  %v3412_v59 = vld [vmem:[#allocation8 + $0x170] ss:$8 sps:$4 sm:$0xff]  }
  0xf8   :  { %1733 = vmatpush2.bf16.msra.mxu0 %v3280_v60  ;;  %v3414_v60 = vld [vmem:[#allocation8 + $0x174] ss:$8 sps:$4 sm:$0xff]  }
  0xf9   :  { %1758 = vmatpush1.bf16.msra.mxu1 %v3283_v61  ;;  %1734 = vmatprep.subr.bf16.mxu0 %v3288_v62  ;;  %v3417_v61 = vld [vmem:[#allocation8 + $0x164] ss:$8 sps:$4 sm:$0xff]   ;;  %v3373_v62 = vld [vmem:[#allocation8 + $0x40] ss:$8 sps:$4 sm:$0xff]  }
  0xfa   :  { %1759 = vmatprep.subr.bf16.mxu1 %v3291_v47  ;;  %v3415_v47 = vld [vmem:[#allocation8 + $0x160] ss:$8 sps:$4 sm:$0xff]  }
  0xfc   :  { %1735 = vmatpush2.bf16.msra.mxu0 %v3286_v63  ;;  %v3376_v63 = vld [vmem:[#allocation8 + $0x30] ss:$8 sps:$4 sm:$0xff]  }
  0xfd   :  { %1760 = vmatpush1.bf16.msra.mxu1 %v3289_v6  ;;  %1736 = vmatprep.subr.bf16.mxu0 %v3294_v0  ;;  %v3418_v6 = vld [vmem:[#allocation8 + $0x150] ss:$8 sps:$4 sm:$0xff]   ;;  %v3381_v0 = vld [vmem:[#allocation8 + $0x24] ss:$8 sps:$4 sm:$0xff]  }
  0xfe   :  { %1761 = vmatprep.subr.bf16.mxu1 %v3297_v1  ;;  %v3423_v1 = vld [vmem:[#allocation8 + $0x144] ss:$8 sps:$4 sm:$0xff]  }
 0x100   :  { %1737 = vmatpush2.bf16.msra.mxu0 %v3292_v2  ;;  %v3379_v2 = vld [vmem:[#allocation8 + $0x20] ss:$8 sps:$4 sm:$0xff]  }
 0x101   :  { %1762 = vmatpush1.bf16.msra.mxu1 %v3295_v3  ;;  %1738 = vmatprep.subr.bf16.mxu0 %v3300_v4  ;;  %v3421_v3 = vld [vmem:[#allocation8 + $0x140] ss:$8 sps:$4 sm:$0xff]   ;;  %v3384_v4 = vld [vmem:[#allocation8 + $0x14] ss:$8 sps:$4 sm:$0xff]  }
 0x102   :  { %1763 = vmatprep.subr.bf16.mxu1 %v3303_v5  ;;  %v3426_v5 = vld [vmem:[#allocation8 + $0x134] ss:$8 sps:$4 sm:$0xff]  }
 0x104   :  { %1739 = vmatpush2.bf16.msra.mxu0 %v3298_v35  ;;  %v3382_v35 = vld [vmem:[#allocation8 + $0x10] ss:$8 sps:$4 sm:$0xff]  }
 0x105   :  { %1764 = vmatpush1.bf16.msra.mxu1 %v3301_v8  ;;  %1740 = vmatprep.subr.bf16.mxu0 %v3306_v9  ;;  %v3424_v8 = vld [vmem:[#allocation8 + $0x130] ss:$8 sps:$4 sm:$0xff]   ;;  %v3387_v9 = vld [vmem:[#allocation8 + $0x4] ss:$8 sps:$4 sm:$0xff]  }
 0x106   :  { %1765 = vmatprep.subr.bf16.mxu1 %v3309_v10  ;;  %v3385_v10 = vld [vmem:[#allocation8] ss:$8 sps:$4 sm:$0xff]  }
 0x108   :  { %1741 = vmatpush2.bf16.msra.mxu0 %v3304_v11  ;;  %v3390_v11 = vld [vmem:[#allocation8 + $0xf4] ss:$8 sps:$4 sm:$0xff]  }
 0x109   :  { %1766 = vmatpush1.bf16.msra.mxu1 %v3307_v12  ;;  %1742 = vmatprep.subr.bf16.mxu0 %v3312_v13  ;;  %v3388_v12 = vld [vmem:[#allocation8 + $0xf0] ss:$8 sps:$4 sm:$0xff]   ;;  %v3393_v13 = vld [vmem:[#allocation8 + $0xe4] ss:$8 sps:$4 sm:$0xff]  }
 0x10a   :  { %1767 = vmatprep.subr.bf16.mxu1 %v3315_v14  ;;  %v3429_v14 = vld [vmem:[#allocation8 + $0x124] ss:$8 sps:$4 sm:$0xff]  }
 0x10c   :  { %1743 = vmatpush2.bf16.msra.mxu0 %v3310_v17  ;;  %v3427_v17 = vld [vmem:[#allocation8 + $0x120] ss:$8 sps:$4 sm:$0xff]  }
 0x10d   :  { %1768 = vmatpush1.bf16.msra.mxu1 %v3313_v18  ;;  %1794 = vmatprep.subr.bf16.mxu0 %v3321_v20  ;;  %v3391_v20 = vld [vmem:[#allocation8 + $0xe0] ss:$8 sps:$4 sm:$0xff]  }
 0x10e   :  { %1769 = vmatprep.subr.bf16.mxu1 %v3318_v19 }
 0x10f   :  { %1745 = vmatmul.mubr.bf16.vlgmr.msra.gmra.mxu0 %v3726_v7  ;;  %v3337_v7 = vld [vmem:[#allocation5 + $0x688] ss:$16 sps:$4 sm:$0xff]  }
 0x110   :  { %1795 = vmatpush1.bf16.msra.mxu0 %v3319_v22  ;;  %1826 = vmatprep.mubr.bf16.mxu0 %v3646_v16  ;;  %v3343_v16 = vld [vmem:[#allocation5 + $0x668] ss:$16 sps:$4 sm:$0xff]  }
 0x111   :  { %1770 = vmatpush2.bf16.msra.mxu1 %v3316_v21  ;;  %1796 = vmatprep.subr.bf16.mxu0 %v3327_v24  ;;  %v3432_v24 = vld [vmem:[#allocation8 + $0x114] ss:$8 sps:$4 sm:$0xff]  }
 0x112   :  { %1771 = vmatprep.subr.bf16.mxu1 %v3324_v23  ;;  %v3396_v23 = vld [vmem:[#allocation8 + $0xd4] ss:$8 sps:$4 sm:$0xff]  }
 0x114   :  { %1797 = vmatpush1.bf16.msra.mxu0 %v3325_v26 }
 0x115   :  { %1772 = vmatpush2.bf16.msra.mxu1 %v3322_v25  ;;  %1798 = vmatprep.subr.bf16.mxu0 %v3333_v28  ;;  %v3430_v25 = vld [vmem:[#allocation8 + $0x110] ss:$8 sps:$4 sm:$0xff]  }
 0x116   :  { %1773 = vmatprep.subr.bf16.mxu1 %v3330_v27  ;;  %v3394_v28 = vld [vmem:[#allocation8 + $0xd0] ss:$8 sps:$4 sm:$0xff]  }
 0x118   :  { %1799 = vmatpush1.bf16.msra.mxu0 %v3331_v30 }
 0x119   :  { %1774 = vmatpush2.bf16.msra.mxu1 %v3328_v29  ;;  %1800 = vmatprep.subr.bf16.mxu0 %v3339_v32  ;;  %v3433_v32 = vld [vmem:[#allocation8 + $0x100] ss:$8 sps:$4 sm:$0xff]  }
 0x11a   :  { %1775 = vmatprep.subr.bf16.mxu1 %v3336_v31  ;;  %v3399_v31 = vld [vmem:[#allocation8 + $0xc4] ss:$8 sps:$4 sm:$0xff]  }
 0x11c   :  { %1801 = vmatpush1.bf16.msra.mxu0 %v3337_v7  ;;  %v3438_v7 = vld [vmem:[#allocation8 + $0x1f4] ss:$8 sps:$4 sm:$0xff]  }
 0x11d   :  { %1776 = vmatpush2.bf16.msra.mxu1 %v3334_v33  ;;  %1802 = vmatprep.subr.bf16.mxu0 %v3345_v34  ;;  %v3435_v33 = vld [vmem:[#allocation8 + $0x104] ss:$8 sps:$4 sm:$0xff]   ;;  %v3436_v34 = vld [vmem:[#allocation8 + $0x1f0] ss:$8 sps:$4 sm:$0xff]  }
 0x11e   :  { %1777 = vmatprep.subr.bf16.mxu1 %v3342_v51  ;;  %v3397_v51 = vld [vmem:[#allocation8 + $0xc0] ss:$8 sps:$4 sm:$0xff]  }
 0x120   :  { %1803 = vmatpush1.bf16.msra.mxu0 %v3343_v16  ;;  %v3441_v16 = vld [vmem:[#allocation8 + $0x1e4] ss:$8 sps:$4 sm:$0xff]  }
 0x121   :  { %1778 = vmatpush2.bf16.msra.mxu1 %v3340_v36  ;;  %1804 = vmatprep.subr.bf16.mxu0 %v3351_v38  ;;  %v3402_v36 = vld [vmem:[#allocation8 + $0xb4] ss:$8 sps:$4 sm:$0xff]   ;;  %v3439_v38 = vld [vmem:[#allocation8 + $0x1e0] ss:$8 sps:$4 sm:$0xff]  }
 0x122   :  { %1779 = vmatprep.subr.bf16.mxu1 %v3348_v37  ;;  %v3400_v37 = vld [vmem:[#allocation8 + $0xb0] ss:$8 sps:$4 sm:$0xff]  }
 0x124   :  { %1805 = vmatpush1.bf16.msra.mxu0 %v3349_v40  ;;  %v3444_v40 = vld [vmem:[#allocation8 + $0x1d4] ss:$8 sps:$4 sm:$0xff]  }
 0x125   :  { %1780 = vmatpush2.bf16.msra.mxu1 %v3346_v39  ;;  %1806 = vmatprep.subr.bf16.mxu0 %v3357_v42  ;;  %v3405_v39 = vld [vmem:[#allocation8 + $0xa4] ss:$8 sps:$4 sm:$0xff]   ;;  %v3442_v42 = vld [vmem:[#allocation8 + $0x1d0] ss:$8 sps:$4 sm:$0xff]  }
 0x126   :  { %1781 = vmatprep.subr.bf16.mxu1 %v3354_v41  ;;  %v3403_v41 = vld [vmem:[#allocation8 + $0xa0] ss:$8 sps:$4 sm:$0xff]  }
 0x128   :  { %1807 = vmatpush1.bf16.msra.mxu0 %v3355_v45  ;;  %v3447_v45 = vld [vmem:[#allocation8 + $0x1c4] ss:$8 sps:$4 sm:$0xff]  }
 0x129   :  { %1782 = vmatpush2.bf16.msra.mxu1 %v3352_v43  ;;  %1808 = vmatprep.subr.bf16.mxu0 %v3363_v48  ;;  %v3408_v43 = vld [vmem:[#allocation8 + $0x94] ss:$8 sps:$4 sm:$0xff]   ;;  %v3445_v48 = vld [vmem:[#allocation8 + $0x1c0] ss:$8 sps:$4 sm:$0xff]  }
 0x12a   :  { %1783 = vmatprep.subr.bf16.mxu1 %v3360_v46  ;;  %v3406_v46 = vld [vmem:[#allocation8 + $0x90] ss:$8 sps:$4 sm:$0xff]  }
 0x12c   :  { %1809 = vmatpush1.bf16.msra.mxu0 %v3361_v50  ;;  %v3450_v50 = vld [vmem:[#allocation8 + $0x1b4] ss:$8 sps:$4 sm:$0xff]  }
 0x12d   :  { %1784 = vmatpush2.bf16.msra.mxu1 %v3358_v49  ;;  %2239 = vmatprep.subr.bf16.mxu0 %v3366_v52  ;;  %v3411_v49 = vld [vmem:[#allocation8 + $0x84] ss:$8 sps:$4 sm:$0xff]   ;;  %v3409_v52 = vld [vmem:[#allocation8 + $0x80] ss:$8 sps:$4 sm:$0xff]  }
 0x12e   :  { %2280 = vmatprep.subr.bf16.mxu1 %v3414_v60 }
 0x12f   :  { %1827 = vmatmul.mubr.bf16.vlgmr.msra.gmra.mxu0 %v3738_v44  ;;  %v3420_v44 = vld [vmem:[#allocation8 + $0x154] ss:$8 sps:$4 sm:$0xff]  }
 0x130   :  { %1786 = vmatmul.mubr.bf16.vlgmr.msra.gmra.mxu1 %v3744_v15  ;;  %2240 = vmatpush1.bf16.msra.mxu0 %v3364_v53  ;;  %v3378_v15 = vld [vmem:[#allocation8 + $0x34] ss:$8 sps:$4 sm:$0xff]   ;;  %v3448_v53 = vld [vmem:[#allocation8 + $0x1b0] ss:$8 sps:$4 sm:$0xff]  }
 0x131   :  { %2241 = vmatprep.subr.bf16.mxu0 %v3369_v54  ;;  %2281 = vmatpush1.bf16.msra.mxu1 %v3412_v59  ;;  %v3453_v54 = vld [vmem:[#allocation8 + $0x1a4] ss:$8 sps:$4 sm:$0xff]   ;;  %v3454_v59 = vld [vmem:[#allocation8 + $0x190] ss:$8 sps:$4 sm:$0xff]  }
 0x132   :  { %2282 = vmatprep.subr.bf16.mxu1 %v3417_v61 }
 0x134   :  { %2242 = vmatpush1.bf16.msra.mxu0 %v3367_v55  ;;  %v3451_v55 = vld [vmem:[#allocation8 + $0x1a0] ss:$8 sps:$4 sm:$0xff]  }
 0x135   :  { %2243 = vmatprep.subr.bf16.mxu0 %v3372_v56  ;;  %2283 = vmatpush1.bf16.msra.mxu1 %v3415_v47  ;;  %v3457_v47 = vld [vmem:[#allocation8 + $0x180] ss:$8 sps:$4 sm:$0xff]  }
 0x136   :  { %2284 = vmatprep.subr.bf16.mxu1 %v3420_v44 }
 0x138   :  { %2244 = vmatpush1.bf16.msra.mxu0 %v3370_v57 }
 0x139   :  { %2245 = vmatprep.subr.bf16.mxu0 %v3375_v58  ;;  %2285 = vmatpush1.bf16.msra.mxu1 %v3418_v6  ;;  %v3456_v58 = vld [vmem:[#allocation8 + $0x194] ss:$8 sps:$4 sm:$0xff]  }
 0x13a   :  { %2286 = vmatprep.subr.bf16.mxu1 %v3423_v1  ;;  %v340_v6 = vld [vmem:[#allocation7] sm:$0xf] }
 0x13c   :  { %2246 = vmatpush1.bf16.msra.mxu0 %v3373_v62  ;;  %v3459_v62 = vld [vmem:[#allocation8 + $0x184] ss:$8 sps:$4 sm:$0xff]  }
 0x13d   :  { %2247 = vmatprep.subr.bf16.mxu0 %v3378_v15  ;;  %2287 = vmatpush1.bf16.msra.mxu1 %v3421_v3  ;;  %v342_v15 = vlaneseq }
 0x13e   :  { %2288 = vmatprep.subr.bf16.mxu1 %v3426_v5 }
 0x13f   :  { %v3762_v44 = vshrl.u32 %v342_v15, 7 }
 0x140   :  { %2248 = vmatpush1.bf16.msra.mxu0 %v3376_v63 }
 0x141   :  { %2249 = vmatprep.subr.bf16.mxu0 %v3381_v0  ;;  %2289 = vmatpush1.bf16.msra.mxu1 %v3424_v8  ;;  %v344_v63 = vsub.s32 0, %v3762_v44  ;;  %v348_v0 = vsub.s32 1, %v3762_v44 }
 0x142   :  { %2290 = vmatprep.subr.bf16.mxu1 %v3429_v14 }
 0x143   :  { %v345_v1 = vrot.slane %v340_v6, %v344_v63 }
 0x144   :  { %2250 = vmatpush1.bf16.msra.mxu0 %v3379_v2  ;;  %v349_v2 = vrot.slane %v340_v6, %v348_v0 }
 0x145   :  { %2251 = vmatprep.subr.bf16.mxu0 %v3384_v4  ;;  %2291 = vmatpush1.bf16.msra.mxu1 %v3427_v17 }
 0x146   :  { %2292 = vmatprep.subr.bf16.mxu1 %v3432_v24 }
 0x148   :  { %2252 = vmatpush1.bf16.msra.mxu0 %v3382_v35 }
 0x149   :  { %2253 = vmatprep.subr.bf16.mxu0 %v3387_v9  ;;  %2293 = vmatpush1.bf16.msra.mxu1 %v3430_v25 }
 0x14a   :  { %2294 = vmatprep.subr.bf16.mxu1 %v3435_v33  ;;  %v352_v33 = vsub.s32 2, %v3762_v44 }
 0x14c   :  { %2254 = vmatpush1.bf16.msra.mxu0 %v3385_v10 }
 0x14d   :  { %2255 = vmatprep.subr.bf16.mxu0 %v3390_v11  ;;  %2295 = vmatpush1.bf16.msra.mxu1 %v3433_v32  ;;  %v3462_v32 = vld [vmem:[#allocation10 + $0x70] sm:$0xff]  }
 0x14e   :  { %2296 = vmatprep.subr.bf16.mxu1 %v3438_v7  ;;  %v3463_v7 = vld [vmem:[#allocation10 + $0x30] sm:$0xff]  }
 0x14f   :  { %v3754_v18 = vpop.f32.mrf.mxu0 }
 0x150   :  { %v3756_v19 = vpop.f32.mrf.mxu1  ;;  %2256 = vmatpush2.bf16.msra.mxu0 %v3388_v12  ;;  %v1542_v3 = vadd.f32 %v3754_v18, %v345_v1 }
 0x151   :  { %v3758_v21 = vpop.f32.mrf.mxu0  ;;  %2257 = vmatprep.subr.bf16.mxu0 %v3393_v13  ;;  %2297 = vmatpush2.bf16.msra.mxu1 %v3436_v34  ;;  %v356_v34 = vsub.s32 3, %v3762_v44  ;;  %v3483_v44 = vld [vmem:[#allocation11] sm:$0xff]  }
 0x152   :  { %v3760_v22 = vpop.f32.mrf.mxu1  ;;  %2298 = vmatprep.subr.bf16.mxu1 %v3441_v16  ;;  %v1544_v4 = vadd.f32 %v3758_v21, %v349_v2  ;;  %v1583_v5 = vadd.f32 %v3756_v19, %v1542_v3  ;;  %v3465_v16 = vld [vmem:[#allocation10 + $0x28] sm:$0xff]  }
 0x153   :  { %v1545_v26 = vpop.f32.mrf.mxu0  ;;  %v3472_v2 = vld [vmem:[#allocation10 + $0x48] sm:$0xff]  }
 0x154   :  { %v1586_v27 = vpop.f32.mrf.mxu1  ;;  %2258 = vmatpush2.bf16.msra.mxu0 %v3391_v20  ;;  %v1585_v8 = vadd.f32 %v3760_v22, %v1544_v4  ;;  %v3473_v3 = vld [vmem:[#allocation10 + $0x8] sm:$0xff]   ;;  %v3474_v4 = vld [vmem:[#allocation10 + $0x40] sm:$0xff]  }
 0x155   :  { %v1546_v29 = vpop.f32.mrf.mxu0  ;;  %2259 = vmatprep.subr.bf16.mxu0 %v3396_v23  ;;  %2299 = vmatpush2.bf16.msra.mxu1 %v3439_v38  ;;  %v357_v38 = vrot.slane %v340_v6, %v356_v34 }
 0x156   :  { %v1587_v30 = vpop.f32.mrf.mxu1  ;;  %2300 = vmatprep.subr.bf16.mxu1 %v3444_v40  ;;  %v3467_v40 = vld [vmem:[#allocation10 + $0x20] sm:$0xff]  }
 0x157   :  { %v3460_v30 = vld [vmem:[#allocation10 + $0x78] sm:$0xff]  }
 0x158   :  { %2260 = vmatpush2.bf16.msra.mxu0 %v3394_v28 }
 0x159   :  { %2261 = vmatprep.subr.bf16.mxu0 %v3399_v31  ;;  %2301 = vmatpush2.bf16.msra.mxu1 %v3442_v42  ;;  %v3461_v31 = vld [vmem:[#allocation10 + $0x38] sm:$0xff]  }
 0x15a   :  { %2302 = vmatprep.subr.bf16.mxu1 %v3447_v45 }
 0x15c   :  { %2262 = vmatpush2.bf16.msra.mxu0 %v3397_v51  ;;  %v3464_v51 = vld [vmem:[#allocation10 + $0x68] sm:$0xff]  }
 0x15d   :  { %2263 = vmatprep.subr.bf16.mxu0 %v3402_v36  ;;  %2303 = vmatpush2.bf16.msra.mxu1 %v3445_v48  ;;  %v353_v36 = vrot.slane %v340_v6, %v352_v33 }
 0x15e   :  { %2304 = vmatprep.subr.bf16.mxu1 %v3450_v50  ;;  %v3469_v50 = vld [vmem:[#allocation10 + $0x18] sm:$0xff]  }
 0x160   :  { %2264 = vmatpush2.bf16.msra.mxu0 %v3400_v37  ;;  %v3466_v37 = vld [vmem:[#allocation10 + $0x60] sm:$0xff]  }
 0x161   :  { %2265 = vmatprep.subr.bf16.mxu0 %v3405_v39  ;;  %2305 = vmatpush2.bf16.msra.mxu1 %v3448_v53 }
 0x162   :  { %2306 = vmatprep.subr.bf16.mxu1 %v3453_v54  ;;  %v3470_v54 = vld [vmem:[#allocation10 + $0x50] sm:$0xff]  }
 0x164   :  { %2266 = vmatpush2.bf16.msra.mxu0 %v3403_v41  ;;  %v3468_v41 = vld [vmem:[#allocation10 + $0x58] sm:$0xff]  }
 0x165   :  { %2267 = vmatprep.subr.bf16.mxu0 %v3408_v43  ;;  %2307 = vmatpush2.bf16.msra.mxu1 %v3451_v55 }
 0x166   :  { %2308 = vmatprep.subr.bf16.mxu1 %v3456_v58 }
 0x168   :  { %2268 = vmatpush2.bf16.msra.mxu0 %v3406_v46 }
 0x169   :  { %2269 = vmatprep.subr.bf16.mxu0 %v3411_v49  ;;  %2309 = vmatpush2.bf16.msra.mxu1 %v3454_v59 }
 0x16a   :  { %2310 = vmatprep.subr.bf16.mxu1 %v3459_v62 }
 0x16c   :  { %2270 = vmatpush2.bf16.msra.mxu0 %v3409_v52 }
 0x16d   :  { %2311 = vmatpush2.bf16.msra.mxu1 %v3457_v47  ;;  %2954 = vmatprep.subr.bf16.mxu0 %v3460_v30 }
 0x170   :  { %v1664_v56 = vpop.f32.mrf.mxu1 }
 0x172   :  { %v1666_v57 = vpop.f32.mrf.mxu1 }
 0x174   :  { %v1668_v60 = vpop.f32.mrf.mxu1 }
 0x175   :  { %v3471_v60 = vld [vmem:[#allocation10 + $0x10] sm:$0xff]  }
 0x176   :  { %v1669_v61 = vpop.f32.mrf.mxu1 }
 0x18f   :  { %v1623_v35 = vpop.f32.mrf.mxu0 }
 0x190   :  { %v1624_v9 = vadd.f32 %v1623_v35, %v1583_v5  ;;  %v3475_v5 = vld [vmem:[#allocation10] sm:$0xff]   ;;  %v3476_v35 = vld [vmem:[#allocation11 + $0x38] sm:$0xff]  }
 0x191   :  { %v1625_v10 = vpop.f32.mrf.mxu0 }
 0x192   :  { %v1665_v11 = vadd.f32 %v1664_v56, %v1624_v9  ;;  %v1626_v12 = vadd.f32 %v1625_v10, %v1585_v8  ;;  %v3647_v8 = vmov 0.0   ;;  %v3477_v9 = vld [vmem:[#allocation11 + $0x30] sm:$0xff]   ;;  %v3478_v10 = vld [vmem:[#allocation11 + $0x28] sm:$0xff]  }
 0x193   :  { %v1627_v13 = vpop.f32.mrf.mxu0  ;;  %2985 = vmatprep.subr.bf16.mxu1 %v3647_v8 }
 0x194   :  { %v1667_v14 = vadd.f32 %v1666_v57, %v1626_v12  ;;  %v1835_v17 = vmax.f32 %v1665_v11, 0.0  ;;  %v3479_v11 = vld [vmem:[#allocation11 + $0x20] sm:$0xff]   ;;  %v3480_v12 = vld [vmem:[#allocation11 + $0x18] sm:$0xff]  }
 0x195   :  { %v1628_v20 = vpop.f32.mrf.mxu0 }
 0x196   :  { %v1836_v23 = vmax.f32 %v1667_v14, 0.0  ;;  %v1839_v25 = vpack.c.bf16 %v1835_v17, %v1835_v17 }
 0x198   :  { %v1840_v24 = vpack.c.bf16 %v1836_v23, %v1836_v23  ;;  %v1907_v23 = vld [vmem:[%s3796_s4] sm:$0x3] }
 0x19a   :  { %2271 = vmatprep.mubr.bf16.mxu0 %v1840_v24  ;;  %v1912_v24 = vrot.slane %v1907_v23, %v344_v63  ;;  %v3482_v63 = vld [vmem:[#allocation11 + $0x8] sm:$0xff]  }
 0x19b   :  { %2272 = vmatmul.mubr.bf16.vlgmr.msra.gmra.mxu0 %v1839_v25  ;;  %v1916_v25 = vrot.slane %v1907_v23, %v348_v0 }
 0x19c   :  { %2955 = vmatpush3.bf16.msra.mxu0 %v3461_v31 }
 0x19d   :  { %2956 = vmatprep.subr.bf16.mxu0 %v3462_v32 }
 0x1a0   :  { %2957 = vmatpush3.bf16.msra.mxu0 %v3463_v7  ;;  %v3481_v7 = vld [vmem:[#allocation11 + $0x10] sm:$0xff]  }
 0x1a1   :  { %2958 = vmatprep.subr.bf16.mxu0 %v3464_v51  ;;  %v2928_v51 = vld [vmem:[%s3798_s6] ss:$0 sm:$0xff]  ;;  %s3604_s6 = scalar_lea.vmem %s2622_s24, 128 }
 0x1a2   :  { %p3605_p2 = scmp.ne.s32.totalorder %s2622_s24, %s3604_s6  ;;  %p3610_p4 = scmp.lt.s32.totalorder %s3604_s6, %s3604_s6 }
 0x1a4   :  { %2959 = vmatpush3.bf16.msra.mxu0 %v3465_v16  ;;  %p3611_p5 = por %p3610_p4, %p3609_p3 }
 0x1a5   :  { %2960 = vmatprep.subr.bf16.mxu0 %v3466_v37 }
 0x1a6   :  { %p3612_p6 = pnand %p3611_p5, %p3605_p2 }
 0x1a8   :  { %2961 = vmatpush3.bf16.msra.mxu0 %v3467_v40 }
 0x1a9   :  { %2962 = vmatprep.subr.bf16.mxu0 %v3468_v41  ;;  %v2945_v41 = vld [vmem:[%s3800_s8] ss:$0 sm:$0xff] }
 0x1ac   :  { %2963 = vmatpush3.bf16.msra.mxu0 %v3469_v50 }
 0x1ad   :  { %2964 = vmatprep.subr.bf16.mxu0 %v3470_v54 }
 0x1b0   :  { %v1705_v18 = vpop.f32.mrf.mxu1  ;;  %2965 = vmatpush3.bf16.msra.mxu0 %v3471_v60 }
 0x1b1   :  { %v1706_v39 = vadd.f32 %v1705_v18, %v353_v36  ;;  %2966 = vmatprep.subr.bf16.mxu0 %v3472_v2 }
 0x1b2   :  { %v1707_v21 = vpop.f32.mrf.mxu1 }
 0x1b3   :  { %v1708_v42 = vadd.f32 %v1707_v21, %v357_v38 }
 0x1b4   :  { %v1709_v26 = vpop.f32.mrf.mxu1  ;;  %2967 = vmatpush3.bf16.msra.mxu0 %v3473_v3 }
 0x1b5   :  { %2968 = vmatprep.subr.bf16.mxu0 %v3474_v4 }
 0x1b6   :  { %v1710_v19 = vpop.f32.mrf.mxu1 }
 0x1b8   :  { %2969 = vmatpush3.bf16.msra.mxu0 %v3475_v5 }
 0x1cf   :  { %v1746_v27 = vpop.f32.mrf.mxu0 }
 0x1d0   :  { %v1747_v43 = vadd.f32 %v1746_v27, %v1706_v39 }
 0x1d1   :  { %v1748_v28 = vpop.f32.mrf.mxu0 }
 0x1d2   :  { %v1749_v48 = vadd.f32 %v1748_v28, %v1708_v42 }
 0x1d3   :  { %v1750_v22 = vpop.f32.mrf.mxu0 }
 0x1d5   :  { %v1751_v29 = vpop.f32.mrf.mxu0 }
 0x1ef   :  { %v1828_v46 = vpop.f32.mrf.mxu0 }
 0x1f0   :  { %v1787_v45 = vpop.f32.mrf.mxu1 }
 0x1f1   :  { %v1788_v49 = vadd.f32 %v1787_v45, %v1747_v43  ;;  %v1830_v53 = vpop.f32.mrf.mxu0 }
 0x1f2   :  { %v1789_v52 = vpop.f32.mrf.mxu1 }
 0x1f3   :  { %v1829_v55 = vadd.f32 %v1828_v46, %v1788_v49  ;;  %v1790_v56 = vadd.f32 %v1789_v52, %v1749_v48  ;;  %v1832_v58 = vpop.f32.mrf.mxu0 }
 0x1f4   :  { %v1791_v57 = vpop.f32.mrf.mxu1 }
 0x1f5   :  { %v1831_v59 = vadd.f32 %v1830_v53, %v1790_v56  ;;  %v1837_v61 = vmax.f32 %v1829_v55, 0.0  ;;  %v1833_v47 = vpop.f32.mrf.mxu0 }
 0x1f6   :  { %v1792_v62 = vpop.f32.mrf.mxu1 }
 0x1f7   :  { %v1838_v15 = vmax.f32 %v1831_v59, 0.0  ;;  %v1841_v1 = vpack.c.bf16 %v1837_v61, %v1837_v61 }
 0x1f9   :  { %v1842_v6 = vpack.c.bf16 %v1838_v15, %v1838_v15 }
 0x1fb   :  { %2312 = vmatprep.mubr.bf16.mxu1 %v1842_v6 }
 0x1fc   :  { %2313 = vmatmul.mubr.bf16.vlgmr.msra.gmra.mxu1 %v1841_v1 }
 0x1fd   :  { %2986 = vmatpush3.bf16.msra.mxu1 %v3476_v35  ;;  %3001 = vmatprep.mubr.msk.bf16.mxu1 %vm3648_vm0, %v3647_v8 }
 0x1fe   :  { %2987 = vmatprep.subr.bf16.mxu1 %v3647_v8 }
 0x201   :  { %2988 = vmatpush3.bf16.msra.mxu1 %v3477_v9 }
 0x202   :  { %2989 = vmatprep.subr.bf16.mxu1 %v3647_v8 }
 0x205   :  { %2990 = vmatpush3.bf16.msra.mxu1 %v3478_v10 }
 0x206   :  { %2991 = vmatprep.subr.bf16.mxu1 %v3647_v8 }
 0x209   :  { %2992 = vmatpush3.bf16.msra.mxu1 %v3479_v11 }
 0x20a   :  { %2993 = vmatprep.subr.bf16.mxu1 %v3647_v8 }
 0x20d   :  { %2994 = vmatpush3.bf16.msra.mxu1 %v3480_v12 }
 0x20e   :  { %2995 = vmatprep.subr.bf16.mxu1 %v3647_v8 }
 0x211   :  { %2996 = vmatpush3.bf16.msra.mxu1 %v3481_v7 }
 0x212   :  { %2997 = vmatprep.subr.bf16.mxu1 %v3647_v8 }
 0x215   :  { %2998 = vmatpush3.bf16.msra.mxu1 %v3482_v63 }
 0x216   :  { %2999 = vmatprep.subr.bf16.mxu1 %v3647_v8 }
 0x219   :  { %3000 = vmatpush3.bf16.msra.mxu1 %v3483_v44 }
 0x25b   :  { %v2273_v13 = vpop.f32.mrf.mxu0 }
 0x25c   :  { %v2274_v18 = vadd.f32 %v2273_v13, %v1912_v24 }
 0x25d   :  { %v2275_v14 = vpop.f32.mrf.mxu0 }
 0x25e   :  { %v2276_v26 = vadd.f32 %v2275_v14, %v1916_v25 }
 0x25f   :  { %v2277_v17 = vpop.f32.mrf.mxu0 }
 0x261   :  { %v2278_v20 = vpop.f32.mrf.mxu0 }
 0x2bc   :  { %v2314_v21 = vpop.f32.mrf.mxu1 }
 0x2bd   :  { %v2315_v19 = vadd.f32 %v2314_v21, %v2274_v18 }
 0x2be   :  { %v2316_v27 = vpop.f32.mrf.mxu1 }
 0x2bf   :  { %v2317_v28 = vadd.f32 %v2316_v27, %v2276_v26  ;;  %v2321_v22 = vmax.f32 %v2315_v19, 0.0 }
 0x2c0   :  { %v2318_v29 = vpop.f32.mrf.mxu1 }
 0x2c1   :  { %v2322_v30 = vmax.f32 %v2317_v28, 0.0  ;;  %v2323_v33 = vpack.c.bf16 %v2321_v22, %v2321_v22 }
 0x2c2   :  { %v2319_v31 = vpop.f32.mrf.mxu1 }
 0x2c3   :  { %v2324_v32 = vpack.c.bf16 %v2322_v30, %v2322_v30 }
 0x2c5   :  { %2492 = vmatprep.mubr.bf16.mxu0 %v2324_v32 }
 0x2c6   :  { %2493 = vmatmul.mubr.bf16.vlgmr.msra.gmra.mxu0 %v2323_v33 }
 0x386   :  { %v2970_v0 = vpop.f32.mrf.mxu0 }
 0x388   :  { %v2971_v34 = vpop.f32.mrf.mxu0 }
 0x389   :  { %v2972_v36 = vadd.f32 %v2971_v34, %v2970_v0 }
 0x38a   :  { %v2973_v16 = vpop.f32.mrf.mxu0 }
 0x38b   :  { %v2495_v37 = vadd.f32 %v2972_v36, %v2928_v51 }
 0x38c   :  { %v2974_v38 = vpop.f32.mrf.mxu0 }
 0x38d   :  { %v2500_v39 = vmax.f32 %v2495_v37, 0.0 }
 0x38f   :  { %v2501_v40 = vpack.c.bf16 %v2500_v39, %v2500_v39 }
 0x391   :  { %3002 = vmatmul.mubr.bf16.vlgmr.msra.gmra.mxu1 %v2501_v40 }
 0x451   :  { %v2607_v42 = vpop.f32.mrf.mxu1 }
 0x452   :  { %v2608_v43 = vadd.f32 %v2945_v41, %v2607_v42 }
 0x453   :  { %v3003_v45 = vpop.f32.mrf.mxu1 }
 0x454   :  { %v2613_v46 = vmax.f32 %v2608_v43, 0.0 }
 0x455   :  { %v2610_v48 = vpop.f32.mrf.mxu1 }
 0x456   :  { %2614 = vst [vmem:[#allocation13] sm:$0xff] %v2613_v46 }
 0x457   :  { %v3004_v49 = vpop.f32.mrf.mxu1 }
 0x458   :  { %3615 = shalt.err (!%p3612_p6)
}
 0x459   :  { %2624 = dma.vmem_to_hbm [thread:$0]  %s2622_s24, 128, %s3801_s9, [#allocation4]  }
 0x45a   :  { %3632 = dma.done.wait [#allocation4], 128  }
 0x45b   :  { %3633 = vsyncadd [#allocation4], 4294967168 }
 0x45c   :  { %2628 = vsyncpa [#allocation3], 1 }
 0x45d   :  { %2629 = vsyncpa [#allocation6], 1 }
 0x45e   :  { %2630 = vsyncpa [#allocation9], 1 }
 0x45f   :  { %2631 = vsyncpa [#allocation12], 1 }
 0x460   :  { %2632 = vsyncpa [#allocation4], 1 }

</bundles_post_ra>
